<compile_context>
chip_gen: v5e
topology: v5e:2x2
jax: 0.10.0
libtpu: 0.0.40
codegen_flags: <defaults>
</compile_context>

<pallas_src>
import jax
import jax.numpy as jnp
from jax.experimental import pallas as pl
from jax.experimental.pallas import tpu as pltpu


# ----------------------------------------------------------------------------- helpers
def _layer_norm(x, g, b, eps=1e-5):
    mu = jnp.mean(x, axis=-1, keepdims=True)
    var = jnp.mean((x - mu) ** 2, axis=-1, keepdims=True)
    return (x - mu) * jax.lax.rsqrt(var + eps) * g + b


def _gelu_exact(x):
    # matches torch.nn.functional.gelu default (erf-based)
    return 0.5 * x * (1.0 + jax.lax.erf(x * (2.0 ** -0.5)))


def _pick_tile(n, candidates):
    for c in candidates:
        if n % c == 0:
            return c
    return n


def _vmem_capacity_bytes():
    try:
        return int(pltpu.get_tpu_info().vmem_capacity_bytes)
    except Exception:
        return 64 << 20          # conservative fallback: v7x per-TensorCore size


def _vmem_limit(block_bytes, capacity):
    # 2x for double buffering + 50% / 2 MiB headroom for tile padding & internal
    # scratch, clamped to ~75% of the physical per-core capacity
    # (v7x: 64 MiB -> <=48 MiB; v5e/v6e: 128 MiB -> <=96 MiB).
    cap = max(16 << 20, int(capacity * 0.75))
    est = int(2 * block_bytes * 1.5) + (2 << 20)
    return min(max(est, min(32 << 20, cap)), cap)


# ----------------------------------------------------------------------------- kernel 1
def _make_proj_kernel(d_model, layer_norm_first, scaling, mm_dtype):
    def kernel(x_ref, ln1g_ref, ln1b_ref, wqkv_ref, bqkv_ref, q_out, k_out, v_out):
        x = x_ref[0].astype(jnp.float32)                         # (tR, D)
        h = _layer_norm(x, ln1g_ref[...], ln1b_ref[...]) if layer_norm_first else x
        qkv = jnp.dot(h.astype(mm_dtype), wqkv_ref[...],
                      preferred_element_type=jnp.float32) + bqkv_ref[...]   # (tR, 3D)
        d = d_model
        # lane-dense (tR, D) stores; q scaled exactly once, after the projection
        q_out[0] = (qkv[:, :d] * scaling).astype(q_out.dtype)
        k_out[0] = qkv[:, d:2 * d].astype(k_out.dtype)
        v_out[0] = qkv[:, 2 * d:].astype(v_out.dtype)

    return kernel


# ----------------------------------------------------------------------------- kernel 2
def _make_attn_ffn_kernel(num_heads, head_dim, layer_norm_first, has_mask,
                          mm_dtype, approx_recip):
    H, hd = num_heads, head_dim

    def split_heads(r):                       # (t, D) -> (H, t, hd), once per tile
        t = r.shape[0]
        return jnp.transpose(r.reshape(t, H, hd), (1, 0, 2))

    def kernel(*refs):
        if has_mask:
            mask_ref, *refs = refs
        (x_ref, q_ref, k_ref, v_ref,
         wo_ref, bo_ref, ln1g_ref, ln1b_ref, ln2g_ref, ln2b_ref,
         w1_ref, b1_ref, w2_ref, b2_ref,
         out_ref, m_ref, l_ref, acc_ref) = refs

        ki = pl.program_id(2)

        @pl.when(ki == 0)
        def _init():
            # -1e30 (not -inf): safe with finite additive masks; a fully -inf
            # masked row would produce NaNs exactly as PyTorch does.
            m_ref[...] = jnp.full(m_ref.shape, -1e30, jnp.float32)
            l_ref[...] = jnp.zeros(l_ref.shape, jnp.float32)
            acc_ref[...] = jnp.zeros(acc_ref.shape, jnp.float32)

        qh = split_heads(q_ref[0])            # (H, tS, hd)  compute dtype
        kh = split_heads(k_ref[0])            # (H, tK, hd)
        vh = split_heads(v_ref[0])            # (H, tK, hd)

        # batched-head QK^T (no explicit per-head loop / transpose of kh)
        s = jnp.einsum('hqd,hkd->hqk', qh, kh,
                       preferred_element_type=jnp.float32)       # (H, tS, tK)
        if has_mask:
            # TODO(synk): (B,1,S,S) masks only; a per-head (B,H,S,S) mask would
            #             silently use head 0 only.
            s = s + mask_ref[0, 0].astype(jnp.float32)

        # online softmax update
        m_prev = m_ref[...]
        m_new = jnp.maximum(m_prev, jnp.max(s, axis=-1, keepdims=True))
        alpha = jnp.exp(m_prev - m_new)
        p = jnp.exp(s - m_new)
        l_ref[...] = alpha * l_ref[...] + jnp.sum(p, axis=-1, keepdims=True)
        acc_ref[...] = alpha * acc_ref[...] + jnp.einsum(
            'hqk,hkd->hqd', p.astype(vh.dtype), vh,
            preferred_element_type=jnp.float32)
        m_ref[...] = m_new

        @pl.when(ki == pl.num_programs(2) - 1)
        def _finalize():
            _, t_s, d = out_ref.shape
            inv_l = (pl.reciprocal(l_ref[...], approx=True) if approx_recip
                     else 1.0 / l_ref[...])
            ctx = acc_ref[...] * inv_l                           # (H, tS, hd) f32
            # one relayout to (tS, D) then a single MXU-dense K=D out-projection
            ctx2 = jnp.transpose(ctx, (1, 0, 2)).reshape(t_s, d)
            attn = jnp.dot(ctx2.astype(mm_dtype), wo_ref[...],
                           preferred_element_type=jnp.float32) + bo_ref[...]

            x1 = x_ref[0].astype(jnp.float32) + attn             # dropout = identity

            def ffn(z):
                h1 = jnp.dot(z.astype(mm_dtype), w1_ref[...],
                             preferred_element_type=jnp.float32) + b1_ref[...]
                h1 = _gelu_exact(h1)
                return jnp.dot(h1.astype(mm_dtype), w2_ref[...],
                               preferred_element_type=jnp.float32) + b2_ref[...]

            if layer_norm_first:
                out = x1 + ffn(_layer_norm(x1, ln2g_ref[...], ln2b_ref[...]))
            else:
                z = _layer_norm(x1, ln1g_ref[...], ln1b_ref[...])
                out = _layer_norm(z + ffn(z), ln2g_ref[...], ln2b_ref[...])
            out_ref[0] = out.astype(out_ref.dtype)

    return kernel


# ----------------------------------------------------------------------------- wrapper
def encoder_layer(x, params, attention_mask=None, *, num_heads,
                  layer_norm_first=True, compute_dtype=jnp.bfloat16,
                  q_tile=None, kv_tile=None, row_tile=None,
                  approx_reciprocal=True, single_buffer_weights=True):
    """Returns (out, position_bias) like the PyTorch module (position_bias=None)."""
    B, S, D = x.shape
    H = num_heads
    assert D % H == 0
    hd = D // H
    F = params['w1'].shape[1]
    f32 = jnp.float32
    cdt = jnp.dtype(compute_dtype)      # default bf16: MXU operands / K,V DMA bytes
    scaling = float(hd) ** -0.5
    has_mask = attention_mask is not None
    if has_mask:
        assert attention_mask.shape == (B, 1, S, S)

    # --- tile selection: prefer large tiles (MXU fill + per-step overhead amortization)
    big = (512, 256, 128, 64, 32, 16, 8)
    tR = row_tile or _pick_tile(S, big)
    tS = q_tile or _pick_tile(S, big)
    if kv_tile is not None:
        tK = kv_tile
    elif has_mask:
        tK = _pick_tile(S, (512, 256, 128))   # mask lane dim must be 128-aligned or full
    else:
        tK = _pick_tile(S, big)
    assert S % tR == 0 and S % tS == 0 and S % tK == 0

    # --- per-generation VMEM budget / pipeline depth
    vmem_cap = _vmem_capacity_bytes()
    kv_steps = S // tK
    kv_buffers = 3 if (vmem_cap >= (96 << 20) and kv_steps >= 3) else 2

    # --- parameters: matmul operands in compute dtype; f32 wherever added to f32
    wqkv = jnp.concatenate(
        [params['wq'], params['wk'], params['wv']], axis=1).astype(cdt)   # (D, 3D)
    bqkv = jnp.concatenate(
        [params['bq'], params['bk'], params['bv']], axis=1).astype(f32)   # (1, 3D)
    wo = params['wo'].astype(cdt)
    w1 = params['w1'].astype(cdt); w2 = params['w2'].astype(cdt)
    bo = params['bo'].astype(f32)
    b1 = params['b1'].astype(f32); b2 = params['b2'].astype(f32)
    ln1g = params['ln1_g'].astype(f32); ln1b = params['ln1_b'].astype(f32)
    ln2g = params['ln2_g'].astype(f32); ln2b = params['ln2_b'].astype(f32)

    xsz = jnp.dtype(x.dtype).itemsize
    csz = jnp.dtype(cdt).itemsize

    def _forward(use_buffered):
        if use_buffered:
            def wspec(shape, index_map):          # constant weights: single-buffered
                return pl.BlockSpec(shape, index_map, pipeline_mode=pl.Buffered(1))

            def kvspec(shape, index_map):         # streamed K/V tiles: deeper pipeline
                if kv_buffers != 2:
                    return pl.BlockSpec(shape, index_map,
                                        pipeline_mode=pl.Buffered(kv_buffers))
                return pl.BlockSpec(shape, index_map)
        else:
            def wspec(shape, index_map):
                return pl.BlockSpec(shape, index_map)
            kvspec = wspec

        # --------------- kernel 1: LayerNorm + fused (D,3D) Q/K/V projection -------
        def c2(b, r):
            return (0, 0)

        qkv_struct = jax.ShapeDtypeStruct((B, S, D), cdt)
        blk1 = (tR * D * xsz + 3 * D * D * csz + 5 * D * 4 + 3 * tR * D * csz)
        vmem1 = _vmem_limit(blk1, vmem_cap)
        ce1 = pl.CostEstimate(
            flops=6 * B * S * D * D,
            transcendentals=B * S,   # rsqrt of the pre-norm
            bytes_accessed=B * S * D * xsz + 3 * D * D * csz + 3 * B * S * D * csz)

        q, k, v = pl.pallas_call(
            _make_proj_kernel(D, layer_norm_first, scaling, cdt),
            out_shape=(qkv_struct, qkv_struct, qkv_struct),
            grid_spec=pltpu.PrefetchScalarGridSpec(
                num_scalar_prefetch=0,
                grid=(B, S // tR),
                in_specs=[
                    pl.BlockSpec((1, tR, D), lambda b, r: (b, r, 0)),   # x rows
                    wspec((1, D), c2), wspec((1, D), c2),               # layer_norm g, b
                    wspec((D, 3 * D), c2), wspec((1, 3 * D), c2),       # fused W_qkv, b_qkv
                ],
                out_specs=[pl.BlockSpec((1, tR, D), lambda b, r: (b, r, 0))] * 3,
            ),
            compiler_params=pltpu.CompilerParams(
                dimension_semantics=("parallel", "parallel"),
                vmem_limit_bytes=vmem1),
            cost_estimate=ce1,
        )(x, ln1g, ln1b, wqkv, bqkv)

        # ---- kernel 2: flash attention + out-proj + residual + LayerNorm + FFN ----
        def c3(b, qi, ki):
            return (0, 0)

        in_specs = []
        mask_args = ()
        if has_mask:
            in_specs.append(pl.BlockSpec((1, 1, tS, tK),
                                         lambda b, qi, ki: (b, 0, qi, ki)))
            # stream the additive mask in the compute dtype (halves mask DMA in bf16)
            mask_args = (attention_mask.astype(cdt),)
        in_specs += [
            pl.BlockSpec((1, tS, D), lambda b, qi, ki: (b, qi, 0)),   # residual x
            pl.BlockSpec((1, tS, D), lambda b, qi, ki: (b, qi, 0)),   # q tile (lane-dense)
            kvspec((1, tK, D), lambda b, qi, ki: (b, ki, 0)),         # k tile
            kvspec((1, tK, D), lambda b, qi, ki: (b, ki, 0)),         # v tile
            wspec((D, D), c3), wspec((1, D), c3),                     # wo, bo
            wspec((1, D), c3), wspec((1, D), c3),                     # layer_norm g, b
            wspec((1, D), c3), wspec((1, D), c3),                     # final_layer_norm g, b
            wspec((D, F), c3), wspec((1, F), c3),                     # ffn intermediate
            wspec((F, D), c3), wspec((1, D), c3),                     # ffn output
        ]

        blk2 = ((tS * tK * csz if has_mask else 0)
                + 2 * tS * D * xsz + tS * D * csz + kv_buffers * tK * D * csz
                + (D * D + 2 * D * F) * csz + (6 * D + F) * 4
                + H * tS * (2 + hd) * 4)
        vmem2 = _vmem_limit(blk2, vmem_cap)
        ce2 = pl.CostEstimate(
            flops=B * (4 * S * S * D + 2 * S * D * D + 4 * S * D * F),
            transcendentals=B * H * S * S + B * S * F,
            bytes_accessed=(3 * B * S * D * csz + 2 * B * S * D * xsz
                            + (D * D + 2 * D * F) * csz
                            + (B * S * S * csz if has_mask else 0)))

        out = pl.pallas_call(
            _make_attn_ffn_kernel(H, hd, layer_norm_first, has_mask, cdt,
                                  approx_reciprocal),
            out_shape=jax.ShapeDtypeStruct((B, S, D), x.dtype),
            grid_spec=pltpu.PrefetchScalarGridSpec(
                num_scalar_prefetch=0,
                grid=(B, S // tS, S // tK),
                in_specs=in_specs,
                out_specs=pl.BlockSpec((1, tS, D), lambda b, qi, ki: (b, qi, 0)),
                scratch_shapes=[
                    pltpu.VMEM((H, tS, 1), jnp.float32),    # running max
                    pltpu.VMEM((H, tS, 1), jnp.float32),    # running denominator
                    pltpu.VMEM((H, tS, hd), jnp.float32),   # context accumulator
                ],
            ),
            compiler_params=pltpu.CompilerParams(
                # (batch, q-tile) parallel: enough iterations to split across the
                # 2 TensorCores on v7x; kv reduction axis is last and "arbitrary".
                dimension_semantics=("parallel", "parallel", "arbitrary"),
                vmem_limit_bytes=vmem2),
            cost_estimate=ce2,
        )(*mask_args, x, q, k, v, wo, bo, ln1g, ln1b, ln2g, ln2b, w1, b1, w2, b2)
        return out

    if single_buffer_weights:
        try:
            return _forward(True), None
        except Exception:
            # pipeline_mode / pl.Buffered not supported by this JAX build — retry
            # with default double-buffering (identical semantics). A genuine kernel
            # bug would also fail below and surface normally.
            pass
    return _forward(False), None


# ----------------------------------------------------------------------------- reference
def ref_encoder_layer(x, params, attention_mask, num_heads, layer_norm_first=True):
    """Pure-JAX reference mirroring the PyTorch EncoderLayer.forward."""
    def ln(v, g, b):
        mu = v.mean(-1, keepdims=True)
        var = ((v - mu) ** 2).mean(-1, keepdims=True)
        return (v - mu) / jnp.sqrt(var + 1e-5) * g + b

    B, S, D = x.shape
    hd = D // num_heads
    residual = x
    h = ln(x, params['ln1_g'], params['ln1_b']) if layer_norm_first else x
    q = (h @ params['wq'] + params['bq']).reshape(B, S, num_heads, hd).transpose(0, 2, 1, 3)
    k = (h @ params['wk'] + params['bk']).reshape(B, S, num_heads, hd).transpose(0, 2, 1, 3)
    v = (h @ params['wv'] + params['bv']).reshape(B, S, num_heads, hd).transpose(0, 2, 1, 3)
    w = (q * (hd ** -0.5)) @ jnp.swapaxes(k, -1, -2)
    if attention_mask is not None:
        w = w + attention_mask
    w = jax.nn.softmax(w, axis=-1)
    o = (w @ v).transpose(0, 2, 1, 3).reshape(B, S, D)
    attn = o @ params['wo'] + params['bo']
    x1 = residual + attn

    def ffn(z):
        h1 = jax.nn.gelu(z @ params['w1'] + params['b1'], approximate=False)
        return h1 @ params['w2'] + params['b2']

    if layer_norm_first:
        return x1 + ffn(ln(x1, params['ln2_g'], params['ln2_b']))
    z = ln(x1, params['ln1_g'], params['ln1_b'])
    return ln(z + ffn(z), params['ln2_g'], params['ln2_b'])


# ----------------------------------------------------------------------------- main
if __name__ == "__main__":
    B, S, D, H, F = 2, 32, 64, 4, 128   # batch, seq, embed_dim, heads, ffn dim
    key = jax.random.PRNGKey(0)
    keys = jax.random.split(key, 16)

    def dense(kk, shape):
        return (0.02 * jax.random.normal(kk, shape)).astype(jnp.float32)

    params = {
        'wq': dense(keys[0], (D, D)), 'bq': dense(keys[1], (1, D)),
        'wk': dense(keys[2], (D, D)), 'bk': dense(keys[3], (1, D)),
        'wv': dense(keys[4], (D, D)), 'bv': dense(keys[5], (1, D)),
        'wo': dense(keys[6], (D, D)), 'bo': dense(keys[7], (1, D)),
        'ln1_g': jnp.ones((1, D), jnp.float32), 'ln1_b': jnp.zeros((1, D), jnp.float32),
        'ln2_g': jnp.ones((1, D), jnp.float32), 'ln2_b': jnp.zeros((1, D), jnp.float32),
        'w1': dense(keys[8], (D, F)), 'b1': dense(keys[9], (1, F)),
        'w2': dense(keys[10], (F, D)), 'b2': dense(keys[11], (1, D)),
    }
    x = jax.random.normal(keys[12], (B, S, D), jnp.float32)
    ref = ref_encoder_layer(x, params, None, H, layer_norm_first=True)

    # 1) pre-norm, no attention mask; f32 compute, exact reciprocal, and forced
    #    multi-tile grid to exercise the online-softmax kv accumulation.
    out, position_bias = encoder_layer(
        x, params, attention_mask=None, num_heads=H, layer_norm_first=True,
        compute_dtype=jnp.float32, approx_reciprocal=False,
        q_tile=16, kv_tile=16, row_tile=16)
    out = jax.block_until_ready(out)
    assert out.shape == (B, S, D) and position_bias is None
    err1 = float(jnp.max(jnp.abs(out - ref)))
    assert jnp.allclose(out, ref, atol=1e-3, rtol=1e-3), err1

    # 2) post-norm + additive (causal) attention mask, f32 compute.
    causal = jnp.tril(jnp.ones((S, S), jnp.float32))
    mask = jnp.where(causal == 1.0, 0.0, -1e9).astype(jnp.float32)
    mask = jnp.broadcast_to(mask, (B, 1, S, S))
    out2, _ = encoder_layer(x, params, attention_mask=mask, num_heads=H,
                            layer_norm_first=False, compute_dtype=jnp.float32,
                            approx_reciprocal=False, q_tile=16)
    out2 = jax.block_until_ready(out2)
    ref2 = ref_encoder_layer(x, params, mask, H, layer_norm_first=False)
    err2 = float(jnp.max(jnp.abs(out2 - ref2)))
    assert jnp.allclose(out2, ref2, atol=1e-3, rtol=1e-3), err2

    # 3) default performance configuration: bf16 MXU operands (fp32 accumulation),
    #    large default tiles, approx reciprocal.
    out3, _ = encoder_layer(x, params, attention_mask=None, num_heads=H,
                            layer_norm_first=True)
    out3 = jax.block_until_ready(out3)
    err3 = float(jnp.max(jnp.abs(out3.astype(jnp.float32) - ref)))
    assert jnp.allclose(out3.astype(jnp.float32), ref, atol=3e-2, rtol=3e-2), err3

    print("KERNEL_OK")
</pallas_src>

<mosaic_0001>
module attributes {stable_mosaic.version = 11 : i64} {
  func.func @kernel(%arg0: i32, %arg1: i32, %arg2: memref<1x16x64xf32, #tpu.memory_space<vmem>>, %arg3: memref<1x64xf32, #tpu.memory_space<vmem>>, %arg4: memref<1x64xf32, #tpu.memory_space<vmem>>, %arg5: memref<64x192xf32, #tpu.memory_space<vmem>>, %arg6: memref<1x192xf32, #tpu.memory_space<vmem>>, %arg7: memref<1x16x64xf32, #tpu.memory_space<vmem>>, %arg8: memref<1x16x64xf32, #tpu.memory_space<vmem>>, %arg9: memref<1x16x64xf32, #tpu.memory_space<vmem>>) attributes {dimension_semantics = [#tpu.dimension_semantics<parallel>, #tpu.dimension_semantics<parallel>], iteration_bounds = array<i64: 2, 2>, scalar_prefetch = 0 : i64, scratch_operands = 0 : i64, tpu.core_type = #tpu.core_type<tc>, window_params = [{transform_indices = @transform_0, window_bounds = array<i64: 1, 16, 64>}, {pipeline_mode = #tpu.pipeline_mode<synchronous>, transform_indices = @transform_1, window_bounds = array<i64: 1, 64>}, {pipeline_mode = #tpu.pipeline_mode<synchronous>, transform_indices = @transform_2, window_bounds = array<i64: 1, 64>}, {pipeline_mode = #tpu.pipeline_mode<synchronous>, transform_indices = @transform_3, window_bounds = array<i64: 64, 192>}, {pipeline_mode = #tpu.pipeline_mode<synchronous>, transform_indices = @transform_4, window_bounds = array<i64: 1, 192>}, {transform_indices = @transform_5, window_bounds = array<i64: 1, 16, 64>}, {transform_indices = @transform_6, window_bounds = array<i64: 1, 16, 64>}, {transform_indices = @transform_7, window_bounds = array<i64: 1, 16, 64>}]} {
    %c0 = arith.constant 0 : index
    %c0_0 = arith.constant 0 : index
    %c0_1 = arith.constant 0 : index
    %0 = vector.load %arg2[%c0, %c0_0, %c0_1] : memref<1x16x64xf32, #tpu.memory_space<vmem>>, vector<1x16x64xf32>
    %1 = vector.shape_cast %0 : vector<1x16x64xf32> to vector<16x64xf32>
    %c0_2 = arith.constant 0 : index
    %c0_3 = arith.constant 0 : index
    %2 = vector.load %arg3[%c0_2, %c0_3] : memref<1x64xf32, #tpu.memory_space<vmem>>, vector<1x64xf32>
    %c0_4 = arith.constant 0 : index
    %c0_5 = arith.constant 0 : index
    %3 = vector.load %arg4[%c0_4, %c0_5] : memref<1x64xf32, #tpu.memory_space<vmem>>, vector<1x64xf32>
    %cst = arith.constant dense<0.000000e+00> : vector<16xf32>
    %4 = vector.multi_reduction <add>, %1, %cst [1] : vector<16x64xf32> to vector<16xf32>
    %5 = vector.shape_cast %4 : vector<16xf32> to vector<16x1xf32>
    %cst_6 = arith.constant 6.400000e+01 : f32
    %6 = vector.broadcast %cst_6 : f32 to vector<16x1xf32>
    %7 = arith.divf %5, %6 : vector<16x1xf32>
    %8 = vector.broadcast %7 : vector<16x1xf32> to vector<16x64xf32>
    %9 = arith.subf %1, %8 : vector<16x64xf32>
    %10 = arith.mulf %9, %9 : vector<16x64xf32>
    %cst_7 = arith.constant dense<0.000000e+00> : vector<16xf32>
    %11 = vector.multi_reduction <add>, %10, %cst_7 [1] : vector<16x64xf32> to vector<16xf32>
    %12 = vector.shape_cast %11 : vector<16xf32> to vector<16x1xf32>
    %cst_8 = arith.constant 6.400000e+01 : f32
    %13 = vector.broadcast %cst_8 : f32 to vector<16x1xf32>
    %14 = arith.divf %12, %13 : vector<16x1xf32>
    %15 = vector.broadcast %7 : vector<16x1xf32> to vector<16x64xf32>
    %16 = arith.subf %1, %15 : vector<16x64xf32>
    %cst_9 = arith.constant 9.99999974E-6 : f32
    %17 = vector.broadcast %cst_9 : f32 to vector<16x1xf32>
    %18 = arith.addf %14, %17 : vector<16x1xf32>
    %19 = math.rsqrt %18 : vector<16x1xf32>
    %20 = vector.broadcast %19 : vector<16x1xf32> to vector<16x64xf32>
    %21 = arith.mulf %16, %20 : vector<16x64xf32>
    %22 = vector.broadcast %2 : vector<1x64xf32> to vector<16x64xf32>
    %23 = arith.mulf %21, %22 : vector<16x64xf32>
    %24 = vector.broadcast %3 : vector<1x64xf32> to vector<16x64xf32>
    %25 = arith.addf %23, %24 : vector<16x64xf32>
    %c0_10 = arith.constant 0 : index
    %c0_11 = arith.constant 0 : index
    %26 = vector.load %arg5[%c0_10, %c0_11] : memref<64x192xf32, #tpu.memory_space<vmem>>, vector<64x192xf32>
    %cst_12 = arith.constant dense<0.000000e+00> : vector<16x192xf32>
    %27 = tpu.matmul %25, %26, %cst_12 {dimension_numbers = #tpu.dot_dimension_numbers<[1], [0], [0], [1], [0, 0, 1, 1], [], []>} : vector<16x64xf32>, vector<64x192xf32>, vector<16x192xf32> -> vector<16x192xf32>
    %c0_13 = arith.constant 0 : index
    %c0_14 = arith.constant 0 : index
    %28 = vector.load %arg6[%c0_13, %c0_14] : memref<1x192xf32, #tpu.memory_space<vmem>>, vector<1x192xf32>
    %29 = vector.broadcast %28 : vector<1x192xf32> to vector<16x192xf32>
    %30 = arith.addf %27, %29 : vector<16x192xf32>
    %31 = vector.extract_strided_slice %30 {offsets = [0, 0], sizes = [16, 64], strides = [1, 1]} : vector<16x192xf32> to vector<16x64xf32>
    %cst_15 = arith.constant 2.500000e-01 : f32
    %32 = vector.broadcast %cst_15 : f32 to vector<16x64xf32>
    %33 = arith.mulf %31, %32 : vector<16x64xf32>
    %c0_16 = arith.constant 0 : index
    %c0_17 = arith.constant 0 : index
    %c0_18 = arith.constant 0 : index
    %34 = vector.load %arg7[%c0_16, %c0_17, %c0_18] : memref<1x16x64xf32, #tpu.memory_space<vmem>>, vector<1x16x64xf32>
    %35 = vector.shape_cast %34 : vector<1x16x64xf32> to vector<16x64xf32>
    %36 = vector.shape_cast %33 : vector<16x64xf32> to vector<1x16x64xf32>
    tpu.vector_store %arg7[%c0_16, %c0_17, %c0_18], %36 {strides = array<i32>} : memref<1x16x64xf32, #tpu.memory_space<vmem>>, vector<1x16x64xf32>,
    %37 = vector.extract_strided_slice %30 {offsets = [0, 64], sizes = [16, 64], strides = [1, 1]} : vector<16x192xf32> to vector<16x64xf32>
    %c0_19 = arith.constant 0 : index
    %c0_20 = arith.constant 0 : index
    %c0_21 = arith.constant 0 : index
    %38 = vector.load %arg8[%c0_19, %c0_20, %c0_21] : memref<1x16x64xf32, #tpu.memory_space<vmem>>, vector<1x16x64xf32>
    %39 = vector.shape_cast %38 : vector<1x16x64xf32> to vector<16x64xf32>
    %40 = vector.shape_cast %37 : vector<16x64xf32> to vector<1x16x64xf32>
    tpu.vector_store %arg8[%c0_19, %c0_20, %c0_21], %40 {strides = array<i32>} : memref<1x16x64xf32, #tpu.memory_space<vmem>>, vector<1x16x64xf32>,
    %41 = vector.extract_strided_slice %30 {offsets = [0, 128], sizes = [16, 64], strides = [1, 1]} : vector<16x192xf32> to vector<16x64xf32>
    %c0_22 = arith.constant 0 : index
    %c0_23 = arith.constant 0 : index
    %c0_24 = arith.constant 0 : index
    %42 = vector.load %arg9[%c0_22, %c0_23, %c0_24] : memref<1x16x64xf32, #tpu.memory_space<vmem>>, vector<1x16x64xf32>
    %43 = vector.shape_cast %42 : vector<1x16x64xf32> to vector<16x64xf32>
    %44 = vector.shape_cast %41 : vector<16x64xf32> to vector<1x16x64xf32>
    tpu.vector_store %arg9[%c0_22, %c0_23, %c0_24], %44 {strides = array<i32>} : memref<1x16x64xf32, #tpu.memory_space<vmem>>, vector<1x16x64xf32>,
    return
  }
  func.func @transform_0(%arg0: i32, %arg1: i32) -> (i32, i32, i32) {
    %c0_i32 = arith.constant 0 : i32
    %c0_i32_0 = arith.constant 0 : i32
    return %arg0, %arg1, %c0_i32 : i32, i32, i32
  }
  func.func @transform_1(%arg0: i32, %arg1: i32) -> (i32, i32) {
    %c0_i32 = arith.constant 0 : i32
    %c0_i32_0 = arith.constant 0 : i32
    %c0_i32_1 = arith.constant 0 : i32
    return %c0_i32, %c0_i32_0 : i32, i32
  }
  func.func @transform_2(%arg0: i32, %arg1: i32) -> (i32, i32) {
    %c0_i32 = arith.constant 0 : i32
    %c0_i32_0 = arith.constant 0 : i32
    %c0_i32_1 = arith.constant 0 : i32
    return %c0_i32, %c0_i32_0 : i32, i32
  }
  func.func @transform_3(%arg0: i32, %arg1: i32) -> (i32, i32) {
    %c0_i32 = arith.constant 0 : i32
    %c0_i32_0 = arith.constant 0 : i32
    %c0_i32_1 = arith.constant 0 : i32
    return %c0_i32, %c0_i32_0 : i32, i32
  }
  func.func @transform_4(%arg0: i32, %arg1: i32) -> (i32, i32) {
    %c0_i32 = arith.constant 0 : i32
    %c0_i32_0 = arith.constant 0 : i32
    %c0_i32_1 = arith.constant 0 : i32
    return %c0_i32, %c0_i32_0 : i32, i32
  }
  func.func @transform_5(%arg0: i32, %arg1: i32) -> (i32, i32, i32) {
    %c0_i32 = arith.constant 0 : i32
    %c0_i32_0 = arith.constant 0 : i32
    return %arg0, %arg1, %c0_i32 : i32, i32, i32
  }
  func.func @transform_6(%arg0: i32, %arg1: i32) -> (i32, i32, i32) {
    %c0_i32 = arith.constant 0 : i32
    %c0_i32_0 = arith.constant 0 : i32
    return %arg0, %arg1, %c0_i32 : i32, i32, i32
  }
  func.func @transform_7(%arg0: i32, %arg1: i32) -> (i32, i32, i32) {
    %c0_i32 = arith.constant 0 : i32
    %c0_i32_0 = arith.constant 0 : i32
    return %arg0, %arg1, %c0_i32 : i32, i32, i32
  }
}

module attributes {stable_mosaic.version = 11 : i64} {
  func.func @kernel(%arg0: i32, %arg1: i32, %arg2: memref<1x16x64xf32, #tpu.memory_space<vmem>>, %arg3: memref<1x64xf32, #tpu.memory_space<vmem>>, %arg4: memref<1x64xf32, #tpu.memory_space<vmem>>, %arg5: memref<64x192xf32, #tpu.memory_space<vmem>>, %arg6: memref<1x192xf32, #tpu.memory_space<vmem>>, %arg7: memref<1x16x64xf32, #tpu.memory_space<vmem>>, %arg8: memref<1x16x64xf32, #tpu.memory_space<vmem>>, %arg9: memref<1x16x64xf32, #tpu.memory_space<vmem>>) attributes {dimension_semantics = [#tpu.dimension_semantics<parallel>, #tpu.dimension_semantics<parallel>], iteration_bounds = array<i64: 2, 2>, scalar_prefetch = 0 : i64, scratch_operands = 0 : i64, tpu.core_type = #tpu.core_type<tc>, window_params = [{transform_indices = @transform_0, window_bounds = array<i64: 1, 16, 64>}, {pipeline_mode = #tpu.pipeline_mode<synchronous>, transform_indices = @transform_1, window_bounds = array<i64: 1, 64>}, {pipeline_mode = #tpu.pipeline_mode<synchronous>, transform_indices = @transform_2, window_bounds = array<i64: 1, 64>}, {pipeline_mode = #tpu.pipeline_mode<synchronous>, transform_indices = @transform_3, window_bounds = array<i64: 64, 192>}, {pipeline_mode = #tpu.pipeline_mode<synchronous>, transform_indices = @transform_4, window_bounds = array<i64: 1, 192>}, {transform_indices = @transform_5, window_bounds = array<i64: 1, 16, 64>}, {transform_indices = @transform_6, window_bounds = array<i64: 1, 16, 64>}, {transform_indices = @transform_7, window_bounds = array<i64: 1, 16, 64>}]} {
    %c0 = arith.constant 0 : index
    %c0_0 = arith.constant 0 : index
    %c0_1 = arith.constant 0 : index
    %0 = vector.load %arg2[%c0, %c0_0, %c0_1] : memref<1x16x64xf32, #tpu.memory_space<vmem>>, vector<1x16x64xf32>
    %1 = vector.shape_cast %0 : vector<1x16x64xf32> to vector<16x64xf32>
    %c0_2 = arith.constant 0 : index
    %c0_3 = arith.constant 0 : index
    %2 = vector.load %arg3[%c0_2, %c0_3] : memref<1x64xf32, #tpu.memory_space<vmem>>, vector<1x64xf32>
    %c0_4 = arith.constant 0 : index
    %c0_5 = arith.constant 0 : index
    %3 = vector.load %arg4[%c0_4, %c0_5] : memref<1x64xf32, #tpu.memory_space<vmem>>, vector<1x64xf32>
    %cst = arith.constant dense<0.000000e+00> : vector<16xf32>
    %4 = vector.multi_reduction <add>, %1, %cst [1] : vector<16x64xf32> to vector<16xf32>
    %5 = vector.shape_cast %4 : vector<16xf32> to vector<16x1xf32>
    %cst_6 = arith.constant 6.400000e+01 : f32
    %6 = vector.broadcast %cst_6 : f32 to vector<16x1xf32>
    %7 = arith.divf %5, %6 : vector<16x1xf32>
    %8 = vector.broadcast %7 : vector<16x1xf32> to vector<16x64xf32>
    %9 = arith.subf %1, %8 : vector<16x64xf32>
    %10 = arith.mulf %9, %9 : vector<16x64xf32>
    %cst_7 = arith.constant dense<0.000000e+00> : vector<16xf32>
    %11 = vector.multi_reduction <add>, %10, %cst_7 [1] : vector<16x64xf32> to vector<16xf32>
    %12 = vector.shape_cast %11 : vector<16xf32> to vector<16x1xf32>
    %cst_8 = arith.constant 6.400000e+01 : f32
    %13 = vector.broadcast %cst_8 : f32 to vector<16x1xf32>
    %14 = arith.divf %12, %13 : vector<16x1xf32>
    %15 = vector.broadcast %7 : vector<16x1xf32> to vector<16x64xf32>
    %16 = arith.subf %1, %15 : vector<16x64xf32>
    %cst_9 = arith.constant 9.99999974E-6 : f32
    %17 = vector.broadcast %cst_9 : f32 to vector<16x1xf32>
    %18 = arith.addf %14, %17 : vector<16x1xf32>
    %19 = math.rsqrt %18 : vector<16x1xf32>
    %20 = vector.broadcast %19 : vector<16x1xf32> to vector<16x64xf32>
    %21 = arith.mulf %16, %20 : vector<16x64xf32>
    %22 = vector.broadcast %2 : vector<1x64xf32> to vector<16x64xf32>
    %23 = arith.mulf %21, %22 : vector<16x64xf32>
    %24 = vector.broadcast %3 : vector<1x64xf32> to vector<16x64xf32>
    %25 = arith.addf %23, %24 : vector<16x64xf32>
    %c0_10 = arith.constant 0 : index
    %c0_11 = arith.constant 0 : index
    %26 = vector.load %arg5[%c0_10, %c0_11] : memref<64x192xf32, #tpu.memory_space<vmem>>, vector<64x192xf32>
    %cst_12 = arith.constant dense<0.000000e+00> : vector<16x192xf32>
    %27 = tpu.matmul %25, %26, %cst_12 {dimension_numbers = #tpu.dot_dimension_numbers<[1], [0], [0], [1], [0, 0, 1, 1], [], []>} : vector<16x64xf32>, vector<64x192xf32>, vector<16x192xf32> -> vector<16x192xf32>
    %c0_13 = arith.constant 0 : index
    %c0_14 = arith.constant 0 : index
    %28 = vector.load %arg6[%c0_13, %c0_14] : memref<1x192xf32, #tpu.memory_space<vmem>>, vector<1x192xf32>
    %29 = vector.broadcast %28 : vector<1x192xf32> to vector<16x192xf32>
    %30 = arith.addf %27, %29 : vector<16x192xf32>
    %31 = vector.extract_strided_slice %30 {offsets = [0, 0], sizes = [16, 64], strides = [1, 1]} : vector<16x192xf32> to vector<16x64xf32>
    %cst_15 = arith.constant 2.500000e-01 : f32
    %32 = vector.broadcast %cst_15 : f32 to vector<16x64xf32>
    %33 = arith.mulf %31, %32 : vector<16x64xf32>
    %c0_16 = arith.constant 0 : index
    %c0_17 = arith.constant 0 : index
    %c0_18 = arith.constant 0 : index
    %34 = vector.load %arg7[%c0_16, %c0_17, %c0_18] : memref<1x16x64xf32, #tpu.memory_space<vmem>>, vector<1x16x64xf32>
    %35 = vector.shape_cast %34 : vector<1x16x64xf32> to vector<16x64xf32>
    %36 = vector.shape_cast %33 : vector<16x64xf32> to vector<1x16x64xf32>
    tpu.vector_store %arg7[%c0_16, %c0_17, %c0_18], %36 {strides = array<i32>} : memref<1x16x64xf32, #tpu.memory_space<vmem>>, vector<1x16x64xf32>,
    %37 = vector.extract_strided_slice %30 {offsets = [0, 64], sizes = [16, 64], strides = [1, 1]} : vector<16x192xf32> to vector<16x64xf32>
    %c0_19 = arith.constant 0 : index
    %c0_20 = arith.constant 0 : index
    %c0_21 = arith.constant 0 : index
    %38 = vector.load %arg8[%c0_19, %c0_20, %c0_21] : memref<1x16x64xf32, #tpu.memory_space<vmem>>, vector<1x16x64xf32>
    %39 = vector.shape_cast %38 : vector<1x16x64xf32> to vector<16x64xf32>
    %40 = vector.shape_cast %37 : vector<16x64xf32> to vector<1x16x64xf32>
    tpu.vector_store %arg8[%c0_19, %c0_20, %c0_21], %40 {strides = array<i32>} : memref<1x16x64xf32, #tpu.memory_space<vmem>>, vector<1x16x64xf32>,
    %41 = vector.extract_strided_slice %30 {offsets = [0, 128], sizes = [16, 64], strides = [1, 1]} : vector<16x192xf32> to vector<16x64xf32>
    %c0_22 = arith.constant 0 : index
    %c0_23 = arith.constant 0 : index
    %c0_24 = arith.constant 0 : index
    %42 = vector.load %arg9[%c0_22, %c0_23, %c0_24] : memref<1x16x64xf32, #tpu.memory_space<vmem>>, vector<1x16x64xf32>
    %43 = vector.shape_cast %42 : vector<1x16x64xf32> to vector<16x64xf32>
    %44 = vector.shape_cast %41 : vector<16x64xf32> to vector<1x16x64xf32>
    tpu.vector_store %arg9[%c0_22, %c0_23, %c0_24], %44 {strides = array<i32>} : memref<1x16x64xf32, #tpu.memory_space<vmem>>, vector<1x16x64xf32>,
    return
  }
  func.func @transform_0(%arg0: i32, %arg1: i32) -> (i32, i32, i32) {
    %c0_i32 = arith.constant 0 : i32
    %c0_i32_0 = arith.constant 0 : i32
    return %arg0, %arg1, %c0_i32 : i32, i32, i32
  }
  func.func @transform_1(%arg0: i32, %arg1: i32) -> (i32, i32) {
    %c0_i32 = arith.constant 0 : i32
    %c0_i32_0 = arith.constant 0 : i32
    %c0_i32_1 = arith.constant 0 : i32
    return %c0_i32, %c0_i32_0 : i32, i32
  }
  func.func @transform_2(%arg0: i32, %arg1: i32) -> (i32, i32) {
    %c0_i32 = arith.constant 0 : i32
    %c0_i32_0 = arith.constant 0 : i32
    %c0_i32_1 = arith.constant 0 : i32
    return %c0_i32, %c0_i32_0 : i32, i32
  }
  func.func @transform_3(%arg0: i32, %arg1: i32) -> (i32, i32) {
    %c0_i32 = arith.constant 0 : i32
    %c0_i32_0 = arith.constant 0 : i32
    %c0_i32_1 = arith.constant 0 : i32
    return %c0_i32, %c0_i32_0 : i32, i32
  }
  func.func @transform_4(%arg0: i32, %arg1: i32) -> (i32, i32) {
    %c0_i32 = arith.constant 0 : i32
    %c0_i32_0 = arith.constant 0 : i32
    %c0_i32_1 = arith.constant 0 : i32
    return %c0_i32, %c0_i32_0 : i32, i32
  }
  func.func @transform_5(%arg0: i32, %arg1: i32) -> (i32, i32, i32) {
    %c0_i32 = arith.constant 0 : i32
    %c0_i32_0 = arith.constant 0 : i32
    return %arg0, %arg1, %c0_i32 : i32, i32, i32
  }
  func.func @transform_6(%arg0: i32, %arg1: i32) -> (i32, i32, i32) {
    %c0_i32 = arith.constant 0 : i32
    %c0_i32_0 = arith.constant 0 : i32
    return %arg0, %arg1, %c0_i32 : i32, i32, i32
  }
  func.func @transform_7(%arg0: i32, %arg1: i32) -> (i32, i32, i32) {
    %c0_i32 = arith.constant 0 : i32
    %c0_i32_0 = arith.constant 0 : i32
    return %arg0, %arg1, %c0_i32 : i32, i32, i32
  }
}

</mosaic_0001>

<bundles_post_ra>
// kernel: tpu_custom_call.1
= control target key start
LH: loop header
LB: loop body
LE: loop exit
PB: predicated region body
PF: predicated region fallthrough
CT: control target
= control target key end

     0   :  { %s1539_s0 = inlined_call_operand.hbm [shape: f32[2,32,64], index: 0, kind: input, shape index: {}]   ;;  %s1540_s1 = inlined_call_operand.hbm [shape: f32[1,64], index: 1, kind: input, shape index: {}]   ;;  %s1541_s2 = inlined_call_operand.vmem [shape: f32[1,64], index: 2, kind: input, shape index: {}]   ;;  %s1542_s3 = inlined_call_operand.hbm [shape: f32[64,192], index: 3, kind: input, shape index: {}]   ;;  %s1543_s4 = inlined_call_operand.vmem [shape: f32[1,192], index: 4, kind: input, shape index: {}]   ;;  %s1544_s5 = inlined_call_operand.hbm [shape: f32[2,32,64], index: 5, kind: output, shape index: {0}]   ;;  %s1545_s6 = inlined_call_operand.hbm [shape: f32[2,32,64], index: 6, kind: output, shape index: {1}]   ;;  %s1546_s7 = inlined_call_operand.hbm [shape: f32[2,32,64], index: 7, kind: output, shape index: {2}]  }
   0x1   :  { %1561 = sst [smem:[#allocation23_spill]] %s1539_s0 }
   0x2   :  { %1562 = sst [smem:[#allocation24_spill]] %s1540_s1 }
   0x3   :  { %1563 = sst [smem:[#allocation25_spill]] %s1541_s2 }
   0x4   :  { %1564 = sst [smem:[#allocation26_spill]] %s1542_s3 }
   0x5   :  { %1565 = sst [smem:[#allocation27_spill]] %s1543_s4 }
   0x6   :  { %1566 = sst [smem:[#allocation28_spill]] %s1544_s5 }
   0x7   :  { %1567 = sst [smem:[#allocation29_spill]] %s1545_s6 }
   0x8   :  { %1568 = sst [smem:[#allocation30_spill]] %s1546_s7 }
   0x9   :  { %13 = vsyncpa [#allocation3], 0 }
   0xa   :  { %15 = vsyncpa [#allocation3 + $0x1], 0 }
   0xb   :  { %16 = vsyncpa [#allocation6], 0 }
   0xc   :  { %17 = vsyncpa [#allocation4], 0 }
   0xd   :  { %19 = vsyncpa [#allocation4 + $0x1], 0 }
   0xe   :  { %20 = vsyncpa [#allocation10], 0 }
   0xf   :  { %22 = vsyncpa [#allocation10 + $0x1], 0  ;;  %s1254_s24 = smov 0   ;;  %s1256_s25 = smov 0  }
  0x10   :  { %s1258_s26 = smov 0   ;;  %s1260_s27 = smov 0  }
  0x11   :  { %s1262_s28 = smov 0   ;;  %s1264_s29 = smov 0  }
  0x12   :  { %s1266_s30 = smov 0   ;;  %s1268_s8 = smov 0  }
  0x13 LB: > { %1569 = sst [smem:[#allocation16_spill]] %s1174_s24  ;;  %s1295_s9 = sadd.s32 4294967295, %s1202_s8   ;;  %s1202_s8 = sphi %s1268_s8, %s28_s8   ;;  %s1198_s30 = sphi %s1266_s30, %s1605_s30   ;;  %s1194_s29 = sphi %s1264_s29, %s1599_s29   ;;  %s1190_s28 = sphi %s1262_s28, %s1604_s28   ;;  %s1186_s27 = sphi %s1260_s27, %s1598_s27   ;;  %s1182_s26 = sphi %s1258_s26, %s1603_s26   ;;  %s1178_s25 = sphi %s1256_s25, %s1602_s25   ;;  %s1174_s24 = sphi %s1254_s24, %s1601_s24  }
  0x14   : > { %1570 = sst [smem:[#allocation17_spill]] %s1194_s29  ;;  %s1547_s10 = sadd.s32 4294967294, %s1202_s8  }
  0x15   : > { %1571 = sst [smem:[#allocation18_spill]] %s1202_s8  ;;  %p56_p0 = scmp.ne.s32.totalorder %s1182_s26, %s1178_s25 }
  0x16   : > { %p57_p1 = scmp.eq.s32.totalorder %s1202_s8, 0  ;;  %p62_p2 = scmp.ne.s32.totalorder %s1178_s25, %s1174_s24 }
  0x17   : > { %p63_p3 = scmp.eq.s32.totalorder %s1295_s9, 0  ;;  %p172_p4 = scmp.eq.s32.totalorder %s1295_s9, 3 }
  0x18   : > { %p1306_p5 = por %p57_p1, %p56_p0  ;;  %p178_p6 = scmp.eq.s32.totalorder %s1547_s10, 3 }
  0x19   : > { %p1314_p7 = por %p63_p3, %p62_p2  ;;  %p1318_p8 = por %p172_p4, %p56_p0 }
  0x1a   : > { %p1322_p9 = por %p178_p6, %p62_p2  ;;  %p776_p10 = scmp.ge.s32.totalorder %s1202_s8, 1 }
  0x1b   : > { %s1574_s14 = scalar_select %p1318_p8, 1, 0 }
  0x1c   : > { %s1576_s15 = scalar_select %p1322_p9, 1, 0 }
  0x1d   : > { %1575 = sst [smem:[#allocation19_spill]] %s1574_s14  ;;  %p241_p11 = scmp.lt.s32.totalorder %s1202_s8, 5 }
  0x1e   : > { %1577 = sst [smem:[#allocation20_spill]] %s1576_s15  ;;  %s1204_s20 = smov [#allocation5]  }
  0x1f   : > { %s1578_s1 = sld [smem:[#allocation24_spill]]  ;;  %p1331_p12 = pnand %p776_p10, %p241_p11 }
  0x20   : > { %s255_s21 = sshll.u32 %s1204_s20, 4  ;;  %p864_p0 = scmp.lt.s32.totalorder %s1202_s8, 4  ;;  %s256_s21 = int_to_ptr.vmem [resolvable:$true] %s255_s21 }
  0x21   : > { %p841_p13 = pneg %p1331_p12  ;;  %s1580_s3 = sld [smem:[#allocation26_spill]] }
  0x22   : > { %p1345_p2 = pnand %p864_p0, %p1306_p5  ;;  %s1205_s20 = smov [#allocation7]  }
  0x23   : > { %p842_p1 = pnand %p841_p13, %p63_p3  ;;  %s269_s10 = sshll.u32 %s1205_s20, 4  ;;  %s270_s10 = int_to_ptr.vmem [resolvable:$true] %s269_s10 }
  0x24   : > { %s1206_s11 = smov 256   ;;  %s37_s22 = sadd.s32 1, %s1194_s29 }
  0x25   : > { %s253_s18 = sshll.u32 %s1578_s1, 4  ;;  %s1207_s1 = smov 16   ;;  %s254_s18 = int_to_ptr.hbm [resolvable:$true] %s253_s18 }
  0x26   : > { %844 = dma.hbm_to_vmem [thread:$0]  (!%p842_p1), %s254_s18, 16, %s256_s21, [#allocation6]  }
  0x27   : > { %s267_s16 = sshll.u32 %s1580_s3, 4  ;;  %s40_s23 = sadd.s32 1, %s1198_s30  ;;  %s268_s16 = int_to_ptr.hbm [resolvable:$true] %s267_s16 }
  0x28   : > { %847 = dma.hbm_to_vmem [thread:$0]  (!%p842_p1), %s268_s16, 2048, %s270_s10, [#allocation6], %s1206_s11, %s1206_s11, %s1207_s1  }
  0x29   : > { %p38_p4 = scmp.ge.s32.totalorder %s37_s22, 2  ;;  %s286_s3 = sand.u32 1, %s1182_s26  }
  0x2a   : > { %s780_s12 = sshll.u32 %s286_s3, 4  ;;  %s781_s20 = sshll.u32 %s1194_s29, 1 }
  0x2b   : > { %s1607_s22 = smov (%p38_p4, %s37_s22), 0  ;;  %s1609_s23 = smov (!%p38_p4, %s40_s23), %s1198_s30 }
  0x2c   : > { %1582 = sst [smem:[#allocation21_spill]] %s1607_s22  ;;  %s45_s15 = ssub.s32 %s1194_s29, %s1607_s22 }
  0x2d   : > { %p42_p5 = scmp.ge.s32.totalorder %s1609_s23, 2  ;;  %s782_s18 = sshll.u32 %s1198_s30, 2 }
  0x2e   : > { %s290_s21 = scalar_lea.vmem [#allocation2], %s780_s12  ;;  %s295_s1 = sadd.s32 %s782_s18, %s781_s20 }
  0x2f   : > { %s300_s24 = sshll.u32 %s290_s21, 4  ;;  %s1611_s23 = smov (%p42_p5, %s1609_s23), 0  ;;  %s301_s24 = int_to_ptr.vmem [resolvable:$true] %s300_s24 }
  0x30   : > { %1583 = sst [smem:[#allocation22_spill]] %s1611_s23  ;;  %s44_s10 = ssub.s32 %s1198_s30, %s1611_s23 }
  0x31   : > { %s783_s11 = sshll.u32 %s295_s1, 3  ;;  %s46_s16 = sor.u32 %s45_s15, %s44_s10 }
  0x32   : > { %s1584_s0 = sld [smem:[#allocation23_spill]]  ;;  %p47_p6 = scmp.eq.s32.totalorder %s46_s16, 0 }
  0x33   : > { %s1585_s29 = sadd.s32 1, %s1182_s26  ;;  %s287_s12 = scalar_lea.sflag [#allocation3], %s286_s3 }
  0x34   : > { %s1369_s14 = scalar_select %p47_p6, %s1182_s26, %s1585_s29  }
  0x35   : > { %s1208_s21 = smov 128   ;;  %s1209_s5 = smov 8  }
  0x36   : > { %312 = sbr.rel (%p1331_p12) target bundleno = 581 (0x245), region = 40  ;;  %s1376_s15 = sand.u32 (!%p1331_p12), 1, %s1178_s25  }
  0x37   : > { %s1379_s7 = sshll.u32 (!%p1331_p12), %s1376_s15, 4  ;;  %s315_s8 = scalar_lea.sflag (!%p1331_p12), [#allocation3], %s1376_s15 }
  0x38   : > { %s297_s22 = scalar_lea.hbm %s1584_s0, %s783_s11  ;;  %s318_s29 = scalar_lea.vmem (!%p1331_p12), [#allocation2], %s1379_s7 }
  0x39   : > { %s298_s6 = sshll.u32 %s297_s22, 4  ;;  %s299_s6 = int_to_ptr.hbm [resolvable:$true] %s298_s6 }
  0x3a   : > { %851 = dma.hbm_to_vmem [thread:$0]  (!%p1345_p2), %s299_s6, 256, %s301_s24, %s287_s12, %s1208_s21, %s1208_s21, %s1209_s5  }
  0x3b   : > { %1157 = dma.done.wait (%p1314_p7), %s315_s8, 256  }
  0x3c   : > { %1159 = vsyncadd (%p1314_p7), %s315_s8, 4294967040 }
  0x3d   : > { %1161 = dma.done.wait (%p63_p3), [#allocation6], 2064  }
  0x3e   : > { %1163 = vsyncadd (%p63_p3), [#allocation6], 4294965232  ;;  %vm378_vm0 = vcmask 523264   ;;  %v375_v0 = vld [vmem:[%s318_s29 + $0x8] sm:$0xff]  ;;  %v374_v2 = vld [vmem:[%s318_s29] sm:$0xff]  ;;  %v1210_v4 = vmov 64.0  }
  0x3f   : > { %v382_v1 = vsel %vm378_vm0, %v375_v0, 0.0  ;;  %v379_v3 = vsel %vm378_vm0, %v374_v2, 0.0  ;;  %944 = vrcp.f32 %v1210_v4  ;;  %v454_v21 = vld [vmem:[#allocation7 + $0x70] sm:$0xff]  ;;  %v455_v22 = vld [vmem:[#allocation7 + $0x78] sm:$0xff]  ;;  %v452_v23 = vld [vmem:[#allocation7 + $0x60] sm:$0xff]  ;;  %s1586_s2 = sld [smem:[#allocation25_spill]] }
  0x40   : > { %383 = vadd.xlane.f32.xlu0 %v382_v1  ;;  %809 = vmatpush.msra.mxu2 %v454_v21  ;;  %v453_v24 = vld [vmem:[#allocation7 + $0x68] sm:$0xff]  ;;  %v450_v25 = vld [vmem:[#allocation7 + $0x50] sm:$0xff]  ;;  %v451_v26 = vld [vmem:[#allocation7 + $0x58] sm:$0xff]  ;;  %s798_s6 = sshll.u32 %s1186_s27, 1  ;;  %s799_s24 = sshll.u32 %s1190_s28, 2 }
  0x41   : > { %817 = vmatpush.msra.mxu3 %v455_v22  ;;  %476 = vmatpush.msra.mxu0 %v454_v21  ;;  %v448_v27 = vld [vmem:[#allocation7 + $0x40] sm:$0xff]  ;;  %v449_v28 = vld [vmem:[#allocation7 + $0x48] sm:$0xff]  ;;  %v446_v29 = vld [vmem:[#allocation7 + $0x30] sm:$0xff]  ;;  %s552_s13 = sadd.s32 %s799_s24, %s798_s6  ;;  %s1587_s4 = sld [smem:[#allocation27_spill]] }
  0x42   : > { %499 = vmatpush.msra.mxu1 %v455_v22  ;;  %810 = vmatpush.msra.mxu2 %v452_v23  ;;  %v447_v30 = vld [vmem:[#allocation7 + $0x38] sm:$0xff]  ;;  %v444_v31 = vld [vmem:[#allocation7 + $0x20] sm:$0xff]  ;;  %v445_v32 = vld [vmem:[#allocation7 + $0x28] sm:$0xff]  ;;  %s1423_s22 = sshll.u32 %s552_s13, 3  ;;  %s1588_s1 = sld [smem:[#allocation28_spill]] }
  0x43   : > { %818 = vmatpush.msra.mxu3 %v453_v24  ;;  %477 = vmatpush.msra.mxu0 %v452_v23  ;;  %v442_v33 = vld [vmem:[#allocation7 + $0x10] sm:$0xff]  ;;  %v443_v34 = vld [vmem:[#allocation7 + $0x18] sm:$0xff]  ;;  %v440_v35 = vld [vmem:[#allocation7] sm:$0xff]  ;;  %s355_s27 = scalar_lea.vmem [#allocation8], %s1379_s7  ;;  %s1433_s16 = scalar_lea.vmem [#allocation11], %s1379_s7 }
  0x44   : > { %500 = vmatpush.msra.mxu1 %v453_v24  ;;  %811 = vmatpush.msra.mxu2 %v450_v25  ;;  %v441_v36 = vld [vmem:[#allocation7 + $0x8] sm:$0xff]  ;;  %v942_v51 = vld [vmem:[#allocation5] ss:$0 sm:$0xff]  ;;  %s555_s28 = sshll.u32 %s355_s27, 4  ;;  %s1211_s21 = smov 64   ;;  %s556_s28 = int_to_ptr.vmem [resolvable:$true] %s555_s28 }
  0x45   : > { %v945_v5 = vpop.eup %944  ;;  %819 = vmatpush.msra.mxu3 %v451_v26  ;;  %478 = vmatpush.msra.mxu0 %v450_v25  ;;  %v943_v55 = vld [vmem:[%s1586_s2] ss:$0 sm:$0xff]  ;;  %s531_s8 = scalar_lea.sflag [#allocation4], %s1376_s15 }
  0x46   : > { %v386_v6 = vmul.f32 64.0, %v945_v5  ;;  %vm390_vm1 = vweird.f32 %v945_v5  ;;  %501 = vmatpush.msra.mxu1 %v451_v26  ;;  %812 = vmatpush.msra.mxu2 %v448_v27 }
  0x47   : > { %820 = vmatpush.msra.mxu3 %v449_v28  ;;  %479 = vmatpush.msra.mxu0 %v448_v27  ;;  %v456_v1 = vld [vmem:[%s1587_s4] sm:$0x3] }
  0x48   : > { %380 = vadd.xlane.f32.xlu0 %v379_v3  ;;  %v387_v7 = vsub.f32 1.0, %v386_v6  ;;  %502 = vmatpush.msra.mxu1 %v449_v28  ;;  %v459_v3 = vperm.slane %v456_v1, 1  ;;  %s554_s10 = scalar_lea.hbm %s1588_s1, %s1423_s22  ;;  %s1060_s24 = scalar_lea.hbm %s1588_s1, 64 }
  0x49   : > { %813 = vmatpush.msra.mxu2 %v446_v29  ;;  %821 = vmatpush.msra.mxu3 %v447_v30  ;;  %s1430_s11 = sshll.u32 %s554_s10, 4  ;;  %s558_s11 = int_to_ptr.hbm [resolvable:$true] %s1430_s11 }
  0x4a   : > { %v388_v8 = vmul.f32 %v945_v5, %v387_v7  ;;  %480 = vmatpush.msra.mxu0 %v446_v29  ;;  %503 = vmatpush.msra.mxu1 %v447_v30  ;;  %s1054_s29 = sshra.s32 %s558_s11, 4  ;;  %s1055_s29 = int_to_ptr.hbm [resolvable:$true] %s1054_s29 }
  0x4b   : > { %814 = vmatpush.msra.mxu2 %v444_v31  ;;  %822 = vmatpush.msra.mxu3 %v445_v32  ;;  %s1056_s3 = scalar_lea.hbm %s1055_s29, 16  ;;  %p1061_p11 = scmp.lt.s32.totalorder %s1055_s29, %s1588_s1 }
  0x4c   : > { %v389_v9 = vadd.f32 %v945_v5, %v388_v8  ;;  %481 = vmatpush.msra.mxu0 %v444_v31  ;;  %504 = vmatpush.msra.mxu1 %v445_v32  ;;  %p1057_p3 = scmp.ne.s32.totalorder %s1055_s29, %s1056_s3  ;;  %p1062_p12 = scmp.lt.s32.totalorder %s1060_s24, %s1056_s3 }
  0x4d   : > { %815 = vmatpush.msra.mxu2 %v442_v33  ;;  %823 = vmatpush.msra.mxu3 %v443_v34 }
  0x4e   : > { %v1393_v10 = vsel %vm390_vm1, %v945_v5, %v389_v9  ;;  %482 = vmatpush.msra.mxu0 %v442_v33  ;;  %505 = vmatpush.msra.mxu1 %v443_v34  ;;  %p1058_p7 = pnand %p1057_p3, %p1318_p8  ;;  %p1063_p13 = por %p1062_p12, %p1061_p11 }
  0x4f   : > { %816 = vmatpush.msra.mxu2 %v440_v35  ;;  %824 = vmatpush.msra.mxu3 %v441_v36 }
  0x50   : > { %483 = vmatpush.msra.mxu0 %v440_v35  ;;  %506 = vmatpush.msra.mxu1 %v441_v36  ;;  %p1059_p10 = pneg %p1058_p7 }
  0x52   : > { %p1064_p0 = pnand %p1063_p13, %p1059_p10 }
  0xb3   : > { %v384_v11 = vpop.xlane.xlu0 %383 }
  0xb4   : > { %v393_v12 = vmul.f32 %v1393_v10, %v384_v11 }
  0xb6   : > { %v1396_v13 = vsub.f32 %v375_v0, %v393_v12 }
  0xb8   : > { %v397_v14 = vmul.f32 %v1396_v13, %v1396_v13 }
  0xba   : > { %v401_v15 = vsel %vm378_vm0, %v397_v14, 0.0 }
  0xbb   : > { %402 = vadd.xlane.f32.xlu1 %v401_v15  ;;  %v381_v16 = vpop.xlane.xlu0 %380 }
  0xbc   : > { %v392_v17 = vmul.f32 %v1393_v10, %v381_v16 }
  0xbe   : > { %v1402_v18 = vsub.f32 %v374_v2, %v392_v17  ;;  %v458_v2 = vperm.slane %v456_v1, 0 }
  0xc0   : > { %v396_v19 = vmul.f32 %v1402_v18, %v1402_v18 }
  0xc2   : > { %v398_v20 = vsel %vm378_vm0, %v396_v19, 0.0 }
  0xc3   : > { %399 = vadd.xlane.f32.xlu1 %v398_v20 }
 0x12e   : > { %v403_v37 = vpop.xlane.xlu1 %402 }
 0x12f   : > { %v405_v38 = vmul.f32 %v403_v37, %v1393_v10 }
 0x131   : > { %v407_v39 = vadd.f32 1e-05, %v405_v38 }
 0x133   : > { %946 = vrsqrt.f32 %v407_v39  ;;  %vm424_vm3 = vweird.f32 %v407_v39 }
 0x136   : > { %v400_v40 = vpop.xlane.xlu1 %399 }
 0x137   : > { %v404_v41 = vmul.f32 %v400_v40, %v1393_v10 }
 0x139   : > { %v947_v42 = vpop.eup %946  ;;  %v406_v43 = vadd.f32 1e-05, %v404_v41 }
 0x13a   : > { %v419_v44 = vmul.f32 %v947_v42, %v407_v39  ;;  %vm425_vm2 = vweird.f32 %v947_v42 }
 0x13b   : > { %948 = vrsqrt.f32 %v406_v43  ;;  %vm426_vm4 = vmor %vm424_vm3, %vm425_vm2  ;;  %vm414_vm6 = vweird.f32 %v406_v43 }
 0x13c   : > { %v420_v45 = vmul.f32 %v947_v42, %v419_v44 }
 0x13e   : > { %v421_v46 = vmul.f32 0.5, %v420_v45 }
 0x140   : > { %v422_v47 = vsub.f32 1.5, %v421_v46 }
 0x141   : > { %v949_v48 = vpop.eup %948 }
 0x142   : > { %v423_v49 = vmul.f32 %v947_v42, %v422_v47  ;;  %v409_v50 = vmul.f32 %v949_v48, %v406_v43  ;;  %vm415_vm5 = vweird.f32 %v949_v48 }
 0x143   : > { %vm416_vm7 = vmor %vm414_vm6, %vm415_vm5 }
 0x144   : > { %v427_v52 = vsel %vm426_vm4, %v947_v42, %v423_v49  ;;  %v410_v53 = vmul.f32 %v949_v48, %v409_v50 }
 0x145   : > { %v429_v54 = vmul.f32 %v427_v52, %v1396_v13 }
 0x146   : > { %v411_v56 = vmul.f32 0.5, %v410_v53 }
 0x147   : > { %v434_v57 = vmul.f32 %v942_v51, %v429_v54 }
 0x148   : > { %v412_v58 = vsub.f32 1.5, %v411_v56 }
 0x149   : > { %v439_v59 = vadd.f32 %v943_v55, %v434_v57 }
 0x14a   : > { %v413_v60 = vmul.f32 %v949_v48, %v412_v58 }
 0x14b   : > { %792 = vmatmul.msk.f32.vlgmr.msra.gmra.mxu2 %vm378_vm0, %v439_v59  ;;  %794 = vmatmul.msk.f32.vlgmr.msra.gmra.mxu3 %vm378_vm0, %v439_v59 }
 0x14c   : > { %v417_v61 = vsel %vm416_vm7, %v949_v48, %v413_v60 }
 0x14d   : > { %v428_v62 = vmul.f32 %v417_v61, %v1402_v18 }
 0x14f   : > { %v433_v63 = vmul.f32 %v942_v51, %v428_v62 }
 0x151   : > { %v438_v0 = vadd.f32 %v943_v55, %v433_v63 }
 0x153   : > { %791 = vmatmul.msk.f32.vlgmr.msra.gmra.mxu0 %vm378_vm0, %v438_v0  ;;  %793 = vmatmul.msk.f32.vlgmr.msra.gmra.mxu1 %vm378_vm0, %v438_v0 }
 0x1ce   : > { %v488_v4 = vpop.f32.mrf.mxu2  ;;  %v511_v5 = vpop.f32.mrf.mxu3 }
 0x1cf   : > { %v489_v6 = vadd.f32 %v488_v4, %v458_v2  ;;  %v512_v7 = vadd.f32 %v511_v5, %v459_v3 }
 0x1d0   : > { %v485_v8 = vpop.f32.mrf.mxu0  ;;  %v508_v9 = vpop.f32.mrf.mxu1 }
 0x1d1   : > { %v515_v10 = vmul.f32 0.25, %v489_v6  ;;  %529 = vst.msk [vmem:[%s1433_s16 + $0x8] sm:$0xff] %vm378_vm0, %v512_v7  ;;  %v486_v11 = vadd.f32 %v485_v8, %v458_v2  ;;  %v509_v12 = vadd.f32 %v508_v9, %v459_v3 }
 0x1d3   : > { %517 = vst.msk [vmem:[%s355_s27 + $0x8] sm:$0xff] %vm378_vm0, %v515_v10  ;;  %v514_v13 = vmul.f32 0.25, %v486_v11  ;;  %520 = vrot.lane.b32.xlu2 %v486_v11, %s1211_s21 }
 0x1d4   : > { %528 = vst.msk [vmem:[%s1433_s16] sm:$0xff] %vm378_vm0, %v509_v12 }
 0x1d5   : > { %516 = vst.msk [vmem:[%s355_s27] sm:$0xff] %vm378_vm0, %v514_v13 }
 0x1d6   : > { %1067 = shalt.err (!%p1064_p0)
}
 0x1d7   : > { %s1212_s15 = smov 128   ;;  %s1213_s17 = smov 8  }
 0x1d8   : > { %835 = dma.vmem_to_hbm [thread:$0]  (%p1318_p8), %s556_s28, 256, %s558_s11, %s531_s8, %s1212_s15, %s1212_s15, %s1213_s17  }
 0x1d9   : > { %s362_s20 = scalar_lea.vmem [#allocation9], %s1379_s7  ;;  %s1590_s27 = sld [smem:[#allocation29_spill]] }
 0x1da   : > { %s1592_s24 = sld [smem:[#allocation30_spill]]  ;;  %s574_s0 = sshll.u32 %s362_s20, 4  ;;  %s575_s0 = int_to_ptr.vmem [resolvable:$true] %s574_s0 }
 0x1db   : > { %522 = vrot.lane.b32.xlu2 %v489_v6, %s1211_s21  ;;  %s535_s1 = sand.u32 1, %s1295_s9   ;;  %s593_s4 = sshll.u32 %s1433_s16, 4  ;;  %s1470_s4 = int_to_ptr.vmem [resolvable:$true] %s593_s4 }
 0x1dc   : > { %s1474_s7 = scalar_lea.sflag [#allocation10], %s535_s1 }
 0x1df   : > { %s1591_s3 = smov %s1590_s27  ;;  %s573_s29 = scalar_lea.hbm %s1590_s27, %s1423_s22 }
 0x1e0   : > { %s1593_s13 = smov %s1592_s24  ;;  %s592_s19 = scalar_lea.hbm %s1592_s24, %s1423_s22 }
 0x1e1   : > { %s576_s2 = sshll.u32 %s573_s29, 4  ;;  %s1468_s23 = sshll.u32 %s592_s19, 4  ;;  %s577_s2 = int_to_ptr.hbm [resolvable:$true] %s576_s2  ;;  %s596_s23 = int_to_ptr.hbm [resolvable:$true] %s1468_s23 }
 0x1e2   : > { %s1082_s28 = sshra.s32 %s577_s2, 4  ;;  %s1088_s16 = scalar_lea.hbm %s1591_s3, 64  ;;  %s1083_s28 = int_to_ptr.hbm [resolvable:$true] %s1082_s28 }
 0x1e3   : > { %s1084_s22 = scalar_lea.hbm %s1083_s28, 16  ;;  %p1089_p5 = scmp.lt.s32.totalorder %s1083_s28, %s1591_s3 }
 0x1e4   : > { %p1085_p1 = scmp.ne.s32.totalorder %s1083_s28, %s1084_s22  ;;  %p1090_p6 = scmp.lt.s32.totalorder %s1088_s16, %s1084_s22 }
 0x1e6   : > { %p1086_p2 = pnand %p1085_p1, %p1318_p8  ;;  %p1091_p3 = por %p1090_p6, %p1089_p5 }
 0x1e8   : > { %p1087_p4 = pneg %p1086_p2 }
 0x1ea   : > { %p1092_p7 = pnand %p1091_p3, %p1087_p4 }
 0x22d   : > { %v521_v14 = vpop.permute.xlu2 %520 }
 0x22e   : > { %526 = vst.msk [vmem:[%s362_s20] sm:$0xff] %vm378_vm0, %v521_v14 }
 0x235   : > { %v523_v15 = vpop.permute.xlu2 %522 }
 0x236   : > { %527 = vst.msk [vmem:[%s362_s20 + $0x8] sm:$0xff] %vm378_vm0, %v523_v15 }
 0x237   : > { %1095 = shalt.err (!%p1092_p7)
}
 0x238   : > { %836 = dma.vmem_to_hbm [thread:$0]  (%p1318_p8), %s575_s0, 256, %s577_s2, %s1474_s7, %s1212_s15, %s1212_s15, %s1213_s17  }
 0x239   : > { %s1110_s1 = sshra.s32 %s596_s23, 4  ;;  %s1116_s27 = scalar_lea.hbm %s1593_s13, 64  ;;  %s1111_s1 = int_to_ptr.hbm [resolvable:$true] %s1110_s1 }
 0x23a   : > { %s1112_s20 = scalar_lea.hbm %s1111_s1, 16  ;;  %p1117_p13 = scmp.lt.s32.totalorder %s1111_s1, %s1593_s13 }
 0x23b   : > { %p1113_p10 = scmp.ne.s32.totalorder %s1111_s1, %s1112_s20  ;;  %p1118_p0 = scmp.lt.s32.totalorder %s1116_s27, %s1112_s20 }
 0x23d   : > { %p1114_p11 = pnand %p1113_p10, %p1318_p8  ;;  %p1119_p1 = por %p1118_p0, %p1117_p13 }
 0x23f   : > { %p1115_p12 = pneg %p1114_p11 }
 0x241   : > { %p1120_p2 = pnand %p1119_p1, %p1115_p12 }
 0x243   : > { %1123 = shalt.err (!%p1120_p2)
}
 0x244   : > { %837 = dma.vmem_to_hbm [thread:$0]  (%p1318_p8), %s1470_s4, 256, %s596_s23, %s1474_s7, %s1212_s15, %s1212_s15, %s1213_s17  }
 0x245 PF: > { %s1594_s0 = sld [smem:[#allocation18_spill]] }
 0x246   : > { %s1595_s2 = sld [smem:[#allocation16_spill]] }
 0x24b   : > { %p867_p4 = scmp.ge.s32.totalorder %s1594_s0, 2 }
 0x24c   : > { %s610_s24 = sand.u32 1, %s1595_s2  }
 0x24d   : > { %p853_p5 = pnand %p867_p4, %p1322_p9  ;;  %s611_s19 = scalar_lea.sflag [#allocation4], %s610_s24 }
 0x24f   : > { %p854_p6 = pneg %p853_p5 }
 0x251   : > { %1165 = dma.done.wait (%p854_p6), %s611_s19, 256  }
 0x252   : > { %1167 = vsyncadd (%p854_p6), %s611_s19, 4294967040  ;;  %s1597_s12 = sadd.s32 4294967294, %s1594_s0  }
 0x253   : > { %s620_s28 = sand.u32 1, %s1597_s12  }
 0x254   : > { %s621_s22 = scalar_lea.sflag [#allocation10], %s620_s28 }
 0x255   : > { %1169 = dma.done.wait (%p854_p6), %s621_s22, 512  }
 0x256   : > { %1171 = vsyncadd (%p854_p6), %s621_s22, 4294966784  ;;  %s28_s8 = sadd.s32 1, %s1594_s0   ;;  %s1598_s27 = sld [smem:[#allocation17_spill]] }
 0x257   : > { %p25_p8 = scmp.ge.s32.totalorder %s28_s8, 6   ;;  %s1599_s29 = sld [smem:[#allocation21_spill]] }
 0x258   : > { %s1600_s4 = sld [smem:[#allocation22_spill]]  ;;  %s1601_s24 = smov %s1178_s25 }
 0x259   : > { %s1602_s25 = smov %s1182_s26  ;;  %s1603_s26 = smov %s1369_s14 }
 0x25a   : > { %s1604_s28 = smov %s1198_s30  ;;  %27 = sbr.rel (!%p25_p8) target bundleno = 19 (0x13), region = 125 }
 0x25e   : > { %s1605_s30 = smov %s1600_s4 }
 0x25f   :  { %637 = vsyncpa [#allocation3], 1 }
 0x260   :  { %639 = vsyncpa [#allocation3 + $0x1], 1 }
 0x261   :  { %640 = vsyncpa [#allocation6], 1 }
 0x262   :  { %641 = vsyncpa [#allocation4], 1 }
 0x263   :  { %643 = vsyncpa [#allocation4 + $0x1], 1 }
 0x264   :  { %644 = vsyncpa [#allocation10], 1 }
 0x265   :  { %646 = vsyncpa [#allocation10 + $0x1], 1 }

// kernel: tpu_custom_call.1
= control target key start
LH: loop header
LB: loop body
LE: loop exit
PB: predicated region body
PF: predicated region fallthrough
CT: control target
= control target key end

     0   :  { %s1539_s0 = inlined_call_operand.hbm [shape: f32[2,32,64], index: 0, kind: input, shape index: {}]   ;;  %s1540_s1 = inlined_call_operand.hbm [shape: f32[1,64], index: 1, kind: input, shape index: {}]   ;;  %s1541_s2 = inlined_call_operand.vmem [shape: f32[1,64], index: 2, kind: input, shape index: {}]   ;;  %s1542_s3 = inlined_call_operand.hbm [shape: f32[64,192], index: 3, kind: input, shape index: {}]   ;;  %s1543_s4 = inlined_call_operand.vmem [shape: f32[1,192], index: 4, kind: input, shape index: {}]   ;;  %s1544_s5 = inlined_call_operand.hbm [shape: f32[2,32,64], index: 5, kind: output, shape index: {0}]   ;;  %s1545_s6 = inlined_call_operand.hbm [shape: f32[2,32,64], index: 6, kind: output, shape index: {1}]   ;;  %s1546_s7 = inlined_call_operand.hbm [shape: f32[2,32,64], index: 7, kind: output, shape index: {2}]  }
   0x1   :  { %1561 = sst [smem:[#allocation23_spill]] %s1539_s0 }
   0x2   :  { %1562 = sst [smem:[#allocation24_spill]] %s1540_s1 }
   0x3   :  { %1563 = sst [smem:[#allocation25_spill]] %s1541_s2 }
   0x4   :  { %1564 = sst [smem:[#allocation26_spill]] %s1542_s3 }
   0x5   :  { %1565 = sst [smem:[#allocation27_spill]] %s1543_s4 }
   0x6   :  { %1566 = sst [smem:[#allocation28_spill]] %s1544_s5 }
   0x7   :  { %1567 = sst [smem:[#allocation29_spill]] %s1545_s6 }
   0x8   :  { %1568 = sst [smem:[#allocation30_spill]] %s1546_s7 }
   0x9   :  { %13 = vsyncpa [#allocation3], 0 }
   0xa   :  { %15 = vsyncpa [#allocation3 + $0x1], 0 }
   0xb   :  { %16 = vsyncpa [#allocation6], 0 }
   0xc   :  { %17 = vsyncpa [#allocation4], 0 }
   0xd   :  { %19 = vsyncpa [#allocation4 + $0x1], 0 }
   0xe   :  { %20 = vsyncpa [#allocation10], 0 }
   0xf   :  { %22 = vsyncpa [#allocation10 + $0x1], 0  ;;  %s1254_s24 = smov 0   ;;  %s1256_s25 = smov 0  }
  0x10   :  { %s1258_s26 = smov 0   ;;  %s1260_s27 = smov 0  }
  0x11   :  { %s1262_s28 = smov 0   ;;  %s1264_s29 = smov 0  }
  0x12   :  { %s1266_s30 = smov 0   ;;  %s1268_s8 = smov 0  }
  0x13 LB: > { %1569 = sst [smem:[#allocation16_spill]] %s1174_s24  ;;  %s1295_s9 = sadd.s32 4294967295, %s1202_s8   ;;  %s1202_s8 = sphi %s1268_s8, %s28_s8   ;;  %s1198_s30 = sphi %s1266_s30, %s1605_s30   ;;  %s1194_s29 = sphi %s1264_s29, %s1599_s29   ;;  %s1190_s28 = sphi %s1262_s28, %s1604_s28   ;;  %s1186_s27 = sphi %s1260_s27, %s1598_s27   ;;  %s1182_s26 = sphi %s1258_s26, %s1603_s26   ;;  %s1178_s25 = sphi %s1256_s25, %s1602_s25   ;;  %s1174_s24 = sphi %s1254_s24, %s1601_s24  }
  0x14   : > { %1570 = sst [smem:[#allocation17_spill]] %s1194_s29  ;;  %s1547_s10 = sadd.s32 4294967294, %s1202_s8  }
  0x15   : > { %1571 = sst [smem:[#allocation18_spill]] %s1202_s8  ;;  %p56_p0 = scmp.ne.s32.totalorder %s1182_s26, %s1178_s25 }
  0x16   : > { %p57_p1 = scmp.eq.s32.totalorder %s1202_s8, 0  ;;  %p62_p2 = scmp.ne.s32.totalorder %s1178_s25, %s1174_s24 }
  0x17   : > { %p63_p3 = scmp.eq.s32.totalorder %s1295_s9, 0  ;;  %p172_p4 = scmp.eq.s32.totalorder %s1295_s9, 3 }
  0x18   : > { %p1306_p5 = por %p57_p1, %p56_p0  ;;  %p178_p6 = scmp.eq.s32.totalorder %s1547_s10, 3 }
  0x19   : > { %p1314_p7 = por %p63_p3, %p62_p2  ;;  %p1318_p8 = por %p172_p4, %p56_p0 }
  0x1a   : > { %p1322_p9 = por %p178_p6, %p62_p2  ;;  %p776_p10 = scmp.ge.s32.totalorder %s1202_s8, 1 }
  0x1b   : > { %s1574_s14 = scalar_select %p1318_p8, 1, 0 }
  0x1c   : > { %s1576_s15 = scalar_select %p1322_p9, 1, 0 }
  0x1d   : > { %1575 = sst [smem:[#allocation19_spill]] %s1574_s14  ;;  %p241_p11 = scmp.lt.s32.totalorder %s1202_s8, 5 }
  0x1e   : > { %1577 = sst [smem:[#allocation20_spill]] %s1576_s15  ;;  %s1204_s20 = smov [#allocation5]  }
  0x1f   : > { %s1578_s1 = sld [smem:[#allocation24_spill]]  ;;  %p1331_p12 = pnand %p776_p10, %p241_p11 }
  0x20   : > { %s255_s21 = sshll.u32 %s1204_s20, 4  ;;  %p864_p0 = scmp.lt.s32.totalorder %s1202_s8, 4  ;;  %s256_s21 = int_to_ptr.vmem [resolvable:$true] %s255_s21 }
  0x21   : > { %p841_p13 = pneg %p1331_p12  ;;  %s1580_s3 = sld [smem:[#allocation26_spill]] }
  0x22   : > { %p1345_p2 = pnand %p864_p0, %p1306_p5  ;;  %s1205_s20 = smov [#allocation7]  }
  0x23   : > { %p842_p1 = pnand %p841_p13, %p63_p3  ;;  %s269_s10 = sshll.u32 %s1205_s20, 4  ;;  %s270_s10 = int_to_ptr.vmem [resolvable:$true] %s269_s10 }
  0x24   : > { %s1206_s11 = smov 256   ;;  %s37_s22 = sadd.s32 1, %s1194_s29 }
  0x25   : > { %s253_s18 = sshll.u32 %s1578_s1, 4  ;;  %s1207_s1 = smov 16   ;;  %s254_s18 = int_to_ptr.hbm [resolvable:$true] %s253_s18 }
  0x26   : > { %844 = dma.hbm_to_vmem [thread:$0]  (!%p842_p1), %s254_s18, 16, %s256_s21, [#allocation6]  }
  0x27   : > { %s267_s16 = sshll.u32 %s1580_s3, 4  ;;  %s40_s23 = sadd.s32 1, %s1198_s30  ;;  %s268_s16 = int_to_ptr.hbm [resolvable:$true] %s267_s16 }
  0x28   : > { %847 = dma.hbm_to_vmem [thread:$0]  (!%p842_p1), %s268_s16, 2048, %s270_s10, [#allocation6], %s1206_s11, %s1206_s11, %s1207_s1  }
  0x29   : > { %p38_p4 = scmp.ge.s32.totalorder %s37_s22, 2  ;;  %s286_s3 = sand.u32 1, %s1182_s26  }
  0x2a   : > { %s780_s12 = sshll.u32 %s286_s3, 4  ;;  %s781_s20 = sshll.u32 %s1194_s29, 1 }
  0x2b   : > { %s1607_s22 = smov (%p38_p4, %s37_s22), 0  ;;  %s1609_s23 = smov (!%p38_p4, %s40_s23), %s1198_s30 }
  0x2c   : > { %1582 = sst [smem:[#allocation21_spill]] %s1607_s22  ;;  %s45_s15 = ssub.s32 %s1194_s29, %s1607_s22 }
  0x2d   : > { %p42_p5 = scmp.ge.s32.totalorder %s1609_s23, 2  ;;  %s782_s18 = sshll.u32 %s1198_s30, 2 }
  0x2e   : > { %s290_s21 = scalar_lea.vmem [#allocation2], %s780_s12  ;;  %s295_s1 = sadd.s32 %s782_s18, %s781_s20 }
  0x2f   : > { %s300_s24 = sshll.u32 %s290_s21, 4  ;;  %s1611_s23 = smov (%p42_p5, %s1609_s23), 0  ;;  %s301_s24 = int_to_ptr.vmem [resolvable:$true] %s300_s24 }
  0x30   : > { %1583 = sst [smem:[#allocation22_spill]] %s1611_s23  ;;  %s44_s10 = ssub.s32 %s1198_s30, %s1611_s23 }
  0x31   : > { %s783_s11 = sshll.u32 %s295_s1, 3  ;;  %s46_s16 = sor.u32 %s45_s15, %s44_s10 }
  0x32   : > { %s1584_s0 = sld [smem:[#allocation23_spill]]  ;;  %p47_p6 = scmp.eq.s32.totalorder %s46_s16, 0 }
  0x33   : > { %s1585_s29 = sadd.s32 1, %s1182_s26  ;;  %s287_s12 = scalar_lea.sflag [#allocation3], %s286_s3 }
  0x34   : > { %s1369_s14 = scalar_select %p47_p6, %s1182_s26, %s1585_s29  }
  0x35   : > { %s1208_s21 = smov 128   ;;  %s1209_s5 = smov 8  }
  0x36   : > { %312 = sbr.rel (%p1331_p12) target bundleno = 581 (0x245), region = 40  ;;  %s1376_s15 = sand.u32 (!%p1331_p12), 1, %s1178_s25  }
  0x37   : > { %s1379_s7 = sshll.u32 (!%p1331_p12), %s1376_s15, 4  ;;  %s315_s8 = scalar_lea.sflag (!%p1331_p12), [#allocation3], %s1376_s15 }
  0x38   : > { %s297_s22 = scalar_lea.hbm %s1584_s0, %s783_s11  ;;  %s318_s29 = scalar_lea.vmem (!%p1331_p12), [#allocation2], %s1379_s7 }
  0x39   : > { %s298_s6 = sshll.u32 %s297_s22, 4  ;;  %s299_s6 = int_to_ptr.hbm [resolvable:$true] %s298_s6 }
  0x3a   : > { %851 = dma.hbm_to_vmem [thread:$0]  (!%p1345_p2), %s299_s6, 256, %s301_s24, %s287_s12, %s1208_s21, %s1208_s21, %s1209_s5  }
  0x3b   : > { %1157 = dma.done.wait (%p1314_p7), %s315_s8, 256  }
  0x3c   : > { %1159 = vsyncadd (%p1314_p7), %s315_s8, 4294967040 }
  0x3d   : > { %1161 = dma.done.wait (%p63_p3), [#allocation6], 2064  }
  0x3e   : > { %1163 = vsyncadd (%p63_p3), [#allocation6], 4294965232  ;;  %vm378_vm0 = vcmask 523264   ;;  %v375_v0 = vld [vmem:[%s318_s29 + $0x8] sm:$0xff]  ;;  %v374_v2 = vld [vmem:[%s318_s29] sm:$0xff]  ;;  %v1210_v4 = vmov 64.0  }
  0x3f   : > { %v382_v1 = vsel %vm378_vm0, %v375_v0, 0.0  ;;  %v379_v3 = vsel %vm378_vm0, %v374_v2, 0.0  ;;  %944 = vrcp.f32 %v1210_v4  ;;  %v454_v21 = vld [vmem:[#allocation7 + $0x70] sm:$0xff]  ;;  %v455_v22 = vld [vmem:[#allocation7 + $0x78] sm:$0xff]  ;;  %v452_v23 = vld [vmem:[#allocation7 + $0x60] sm:$0xff]  ;;  %s1586_s2 = sld [smem:[#allocation25_spill]] }
  0x40   : > { %383 = vadd.xlane.f32.xlu0 %v382_v1  ;;  %809 = vmatpush.msra.mxu2 %v454_v21  ;;  %v453_v24 = vld [vmem:[#allocation7 + $0x68] sm:$0xff]  ;;  %v450_v25 = vld [vmem:[#allocation7 + $0x50] sm:$0xff]  ;;  %v451_v26 = vld [vmem:[#allocation7 + $0x58] sm:$0xff]  ;;  %s798_s6 = sshll.u32 %s1186_s27, 1  ;;  %s799_s24 = sshll.u32 %s1190_s28, 2 }
  0x41   : > { %817 = vmatpush.msra.mxu3 %v455_v22  ;;  %476 = vmatpush.msra.mxu0 %v454_v21  ;;  %v448_v27 = vld [vmem:[#allocation7 + $0x40] sm:$0xff]  ;;  %v449_v28 = vld [vmem:[#allocation7 + $0x48] sm:$0xff]  ;;  %v446_v29 = vld [vmem:[#allocation7 + $0x30] sm:$0xff]  ;;  %s552_s13 = sadd.s32 %s799_s24, %s798_s6  ;;  %s1587_s4 = sld [smem:[#allocation27_spill]] }
  0x42   : > { %499 = vmatpush.msra.mxu1 %v455_v22  ;;  %810 = vmatpush.msra.mxu2 %v452_v23  ;;  %v447_v30 = vld [vmem:[#allocation7 + $0x38] sm:$0xff]  ;;  %v444_v31 = vld [vmem:[#allocation7 + $0x20] sm:$0xff]  ;;  %v445_v32 = vld [vmem:[#allocation7 + $0x28] sm:$0xff]  ;;  %s1423_s22 = sshll.u32 %s552_s13, 3  ;;  %s1588_s1 = sld [smem:[#allocation28_spill]] }
  0x43   : > { %818 = vmatpush.msra.mxu3 %v453_v24  ;;  %477 = vmatpush.msra.mxu0 %v452_v23  ;;  %v442_v33 = vld [vmem:[#allocation7 + $0x10] sm:$0xff]  ;;  %v443_v34 = vld [vmem:[#allocation7 + $0x18] sm:$0xff]  ;;  %v440_v35 = vld [vmem:[#allocation7] sm:$0xff]  ;;  %s355_s27 = scalar_lea.vmem [#allocation8], %s1379_s7  ;;  %s1433_s16 = scalar_lea.vmem [#allocation11], %s1379_s7 }
  0x44   : > { %500 = vmatpush.msra.mxu1 %v453_v24  ;;  %811 = vmatpush.msra.mxu2 %v450_v25  ;;  %v441_v36 = vld [vmem:[#allocation7 + $0x8] sm:$0xff]  ;;  %v942_v51 = vld [vmem:[#allocation5] ss:$0 sm:$0xff]  ;;  %s555_s28 = sshll.u32 %s355_s27, 4  ;;  %s1211_s21 = smov 64   ;;  %s556_s28 = int_to_ptr.vmem [resolvable:$true] %s555_s28 }
  0x45   : > { %v945_v5 = vpop.eup %944  ;;  %819 = vmatpush.msra.mxu3 %v451_v26  ;;  %478 = vmatpush.msra.mxu0 %v450_v25  ;;  %v943_v55 = vld [vmem:[%s1586_s2] ss:$0 sm:$0xff]  ;;  %s531_s8 = scalar_lea.sflag [#allocation4], %s1376_s15 }
  0x46   : > { %v386_v6 = vmul.f32 64.0, %v945_v5  ;;  %vm390_vm1 = vweird.f32 %v945_v5  ;;  %501 = vmatpush.msra.mxu1 %v451_v26  ;;  %812 = vmatpush.msra.mxu2 %v448_v27 }
  0x47   : > { %820 = vmatpush.msra.mxu3 %v449_v28  ;;  %479 = vmatpush.msra.mxu0 %v448_v27  ;;  %v456_v1 = vld [vmem:[%s1587_s4] sm:$0x3] }
  0x48   : > { %380 = vadd.xlane.f32.xlu0 %v379_v3  ;;  %v387_v7 = vsub.f32 1.0, %v386_v6  ;;  %502 = vmatpush.msra.mxu1 %v449_v28  ;;  %v459_v3 = vperm.slane %v456_v1, 1  ;;  %s554_s10 = scalar_lea.hbm %s1588_s1, %s1423_s22  ;;  %s1060_s24 = scalar_lea.hbm %s1588_s1, 64 }
  0x49   : > { %813 = vmatpush.msra.mxu2 %v446_v29  ;;  %821 = vmatpush.msra.mxu3 %v447_v30  ;;  %s1430_s11 = sshll.u32 %s554_s10, 4  ;;  %s558_s11 = int_to_ptr.hbm [resolvable:$true] %s1430_s11 }
  0x4a   : > { %v388_v8 = vmul.f32 %v945_v5, %v387_v7  ;;  %480 = vmatpush.msra.mxu0 %v446_v29  ;;  %503 = vmatpush.msra.mxu1 %v447_v30  ;;  %s1054_s29 = sshra.s32 %s558_s11, 4  ;;  %s1055_s29 = int_to_ptr.hbm [resolvable:$true] %s1054_s29 }
  0x4b   : > { %814 = vmatpush.msra.mxu2 %v444_v31  ;;  %822 = vmatpush.msra.mxu3 %v445_v32  ;;  %s1056_s3 = scalar_lea.hbm %s1055_s29, 16  ;;  %p1061_p11 = scmp.lt.s32.totalorder %s1055_s29, %s1588_s1 }
  0x4c   : > { %v389_v9 = vadd.f32 %v945_v5, %v388_v8  ;;  %481 = vmatpush.msra.mxu0 %v444_v31  ;;  %504 = vmatpush.msra.mxu1 %v445_v32  ;;  %p1057_p3 = scmp.ne.s32.totalorder %s1055_s29, %s1056_s3  ;;  %p1062_p12 = scmp.lt.s32.totalorder %s1060_s24, %s1056_s3 }
  0x4d   : > { %815 = vmatpush.msra.mxu2 %v442_v33  ;;  %823 = vmatpush.msra.mxu3 %v443_v34 }
  0x4e   : > { %v1393_v10 = vsel %vm390_vm1, %v945_v5, %v389_v9  ;;  %482 = vmatpush.msra.mxu0 %v442_v33  ;;  %505 = vmatpush.msra.mxu1 %v443_v34  ;;  %p1058_p7 = pnand %p1057_p3, %p1318_p8  ;;  %p1063_p13 = por %p1062_p12, %p1061_p11 }
  0x4f   : > { %816 = vmatpush.msra.mxu2 %v440_v35  ;;  %824 = vmatpush.msra.mxu3 %v441_v36 }
  0x50   : > { %483 = vmatpush.msra.mxu0 %v440_v35  ;;  %506 = vmatpush.msra.mxu1 %v441_v36  ;;  %p1059_p10 = pneg %p1058_p7 }
  0x52   : > { %p1064_p0 = pnand %p1063_p13, %p1059_p10 }
  0xb3   : > { %v384_v11 = vpop.xlane.xlu0 %383 }
  0xb4   : > { %v393_v12 = vmul.f32 %v1393_v10, %v384_v11 }
  0xb6   : > { %v1396_v13 = vsub.f32 %v375_v0, %v393_v12 }
  0xb8   : > { %v397_v14 = vmul.f32 %v1396_v13, %v1396_v13 }
  0xba   : > { %v401_v15 = vsel %vm378_vm0, %v397_v14, 0.0 }
  0xbb   : > { %402 = vadd.xlane.f32.xlu1 %v401_v15  ;;  %v381_v16 = vpop.xlane.xlu0 %380 }
  0xbc   : > { %v392_v17 = vmul.f32 %v1393_v10, %v381_v16 }
  0xbe   : > { %v1402_v18 = vsub.f32 %v374_v2, %v392_v17  ;;  %v458_v2 = vperm.slane %v456_v1, 0 }
  0xc0   : > { %v396_v19 = vmul.f32 %v1402_v18, %v1402_v18 }
  0xc2   : > { %v398_v20 = vsel %vm378_vm0, %v396_v19, 0.0 }
  0xc3   : > { %399 = vadd.xlane.f32.xlu1 %v398_v20 }
 0x12e   : > { %v403_v37 = vpop.xlane.xlu1 %402 }
 0x12f   : > { %v405_v38 = vmul.f32 %v403_v37, %v1393_v10 }
 0x131   : > { %v407_v39 = vadd.f32 1e-05, %v405_v38 }
 0x133   : > { %946 = vrsqrt.f32 %v407_v39  ;;  %vm424_vm3 = vweird.f32 %v407_v39 }
 0x136   : > { %v400_v40 = vpop.xlane.xlu1 %399 }
 0x137   : > { %v404_v41 = vmul.f32 %v400_v40, %v1393_v10 }
 0x139   : > { %v947_v42 = vpop.eup %946  ;;  %v406_v43 = vadd.f32 1e-05, %v404_v41 }
 0x13a   : > { %v419_v44 = vmul.f32 %v947_v42, %v407_v39  ;;  %vm425_vm2 = vweird.f32 %v947_v42 }
 0x13b   : > { %948 = vrsqrt.f32 %v406_v43  ;;  %vm426_vm4 = vmor %vm424_vm3, %vm425_vm2  ;;  %vm414_vm6 = vweird.f32 %v406_v43 }
 0x13c   : > { %v420_v45 = vmul.f32 %v947_v42, %v419_v44 }
 0x13e   : > { %v421_v46 = vmul.f32 0.5, %v420_v45 }
 0x140   : > { %v422_v47 = vsub.f32 1.5, %v421_v46 }
 0x141   : > { %v949_v48 = vpop.eup %948 }
 0x142   : > { %v423_v49 = vmul.f32 %v947_v42, %v422_v47  ;;  %v409_v50 = vmul.f32 %v949_v48, %v406_v43  ;;  %vm415_vm5 = vweird.f32 %v949_v48 }
 0x143   : > { %vm416_vm7 = vmor %vm414_vm6, %vm415_vm5 }
 0x144   : > { %v427_v52 = vsel %vm426_vm4, %v947_v42, %v423_v49  ;;  %v410_v53 = vmul.f32 %v949_v48, %v409_v50 }
 0x145   : > { %v429_v54 = vmul.f32 %v427_v52, %v1396_v13 }
 0x146   : > { %v411_v56 = vmul.f32 0.5, %v410_v53 }
 0x147   : > { %v434_v57 = vmul.f32 %v942_v51, %v429_v54 }
 0x148   : > { %v412_v58 = vsub.f32 1.5, %v411_v56 }
 0x149   : > { %v439_v59 = vadd.f32 %v943_v55, %v434_v57 }
 0x14a   : > { %v413_v60 = vmul.f32 %v949_v48, %v412_v58 }
 0x14b   : > { %792 = vmatmul.msk.f32.vlgmr.msra.gmra.mxu2 %vm378_vm0, %v439_v59  ;;  %794 = vmatmul.msk.f32.vlgmr.msra.gmra.mxu3 %vm378_vm0, %v439_v59 }
 0x14c   : > { %v417_v61 = vsel %vm416_vm7, %v949_v48, %v413_v60 }
 0x14d   : > { %v428_v62 = vmul.f32 %v417_v61, %v1402_v18 }
 0x14f   : > { %v433_v63 = vmul.f32 %v942_v51, %v428_v62 }
 0x151   : > { %v438_v0 = vadd.f32 %v943_v55, %v433_v63 }
 0x153   : > { %791 = vmatmul.msk.f32.vlgmr.msra.gmra.mxu0 %vm378_vm0, %v438_v0  ;;  %793 = vmatmul.msk.f32.vlgmr.msra.gmra.mxu1 %vm378_vm0, %v438_v0 }
 0x1ce   : > { %v488_v4 = vpop.f32.mrf.mxu2  ;;  %v511_v5 = vpop.f32.mrf.mxu3 }
 0x1cf   : > { %v489_v6 = vadd.f32 %v488_v4, %v458_v2  ;;  %v512_v7 = vadd.f32 %v511_v5, %v459_v3 }
 0x1d0   : > { %v485_v8 = vpop.f32.mrf.mxu0  ;;  %v508_v9 = vpop.f32.mrf.mxu1 }
 0x1d1   : > { %v515_v10 = vmul.f32 0.25, %v489_v6  ;;  %529 = vst.msk [vmem:[%s1433_s16 + $0x8] sm:$0xff] %vm378_vm0, %v512_v7  ;;  %v486_v11 = vadd.f32 %v485_v8, %v458_v2  ;;  %v509_v12 = vadd.f32 %v508_v9, %v459_v3 }
 0x1d3   : > { %517 = vst.msk [vmem:[%s355_s27 + $0x8] sm:$0xff] %vm378_vm0, %v515_v10  ;;  %v514_v13 = vmul.f32 0.25, %v486_v11  ;;  %520 = vrot.lane.b32.xlu2 %v486_v11, %s1211_s21 }
 0x1d4   : > { %528 = vst.msk [vmem:[%s1433_s16] sm:$0xff] %vm378_vm0, %v509_v12 }
 0x1d5   : > { %516 = vst.msk [vmem:[%s355_s27] sm:$0xff] %vm378_vm0, %v514_v13 }
 0x1d6   : > { %1067 = shalt.err (!%p1064_p0)
}
 0x1d7   : > { %s1212_s15 = smov 128   ;;  %s1213_s17 = smov 8  }
 0x1d8   : > { %835 = dma.vmem_to_hbm [thread:$0]  (%p1318_p8), %s556_s28, 256, %s558_s11, %s531_s8, %s1212_s15, %s1212_s15, %s1213_s17  }
 0x1d9   : > { %s362_s20 = scalar_lea.vmem [#allocation9], %s1379_s7  ;;  %s1590_s27 = sld [smem:[#allocation29_spill]] }
 0x1da   : > { %s1592_s24 = sld [smem:[#allocation30_spill]]  ;;  %s574_s0 = sshll.u32 %s362_s20, 4  ;;  %s575_s0 = int_to_ptr.vmem [resolvable:$true] %s574_s0 }
 0x1db   : > { %522 = vrot.lane.b32.xlu2 %v489_v6, %s1211_s21  ;;  %s535_s1 = sand.u32 1, %s1295_s9   ;;  %s593_s4 = sshll.u32 %s1433_s16, 4  ;;  %s1470_s4 = int_to_ptr.vmem [resolvable:$true] %s593_s4 }
 0x1dc   : > { %s1474_s7 = scalar_lea.sflag [#allocation10], %s535_s1 }
 0x1df   : > { %s1591_s3 = smov %s1590_s27  ;;  %s573_s29 = scalar_lea.hbm %s1590_s27, %s1423_s22 }
 0x1e0   : > { %s1593_s13 = smov %s1592_s24  ;;  %s592_s19 = scalar_lea.hbm %s1592_s24, %s1423_s22 }
 0x1e1   : > { %s576_s2 = sshll.u32 %s573_s29, 4  ;;  %s1468_s23 = sshll.u32 %s592_s19, 4  ;;  %s577_s2 = int_to_ptr.hbm [resolvable:$true] %s576_s2  ;;  %s596_s23 = int_to_ptr.hbm [resolvable:$true] %s1468_s23 }
 0x1e2   : > { %s1082_s28 = sshra.s32 %s577_s2, 4  ;;  %s1088_s16 = scalar_lea.hbm %s1591_s3, 64  ;;  %s1083_s28 = int_to_ptr.hbm [resolvable:$true] %s1082_s28 }
 0x1e3   : > { %s1084_s22 = scalar_lea.hbm %s1083_s28, 16  ;;  %p1089_p5 = scmp.lt.s32.totalorder %s1083_s28, %s1591_s3 }
 0x1e4   : > { %p1085_p1 = scmp.ne.s32.totalorder %s1083_s28, %s1084_s22  ;;  %p1090_p6 = scmp.lt.s32.totalorder %s1088_s16, %s1084_s22 }
 0x1e6   : > { %p1086_p2 = pnand %p1085_p1, %p1318_p8  ;;  %p1091_p3 = por %p1090_p6, %p1089_p5 }
 0x1e8   : > { %p1087_p4 = pneg %p1086_p2 }
 0x1ea   : > { %p1092_p7 = pnand %p1091_p3, %p1087_p4 }
 0x22d   : > { %v521_v14 = vpop.permute.xlu2 %520 }
 0x22e   : > { %526 = vst.msk [vmem:[%s362_s20] sm:$0xff] %vm378_vm0, %v521_v14 }
 0x235   : > { %v523_v15 = vpop.permute.xlu2 %522 }
 0x236   : > { %527 = vst.msk [vmem:[%s362_s20 + $0x8] sm:$0xff] %vm378_vm0, %v523_v15 }
 0x237   : > { %1095 = shalt.err (!%p1092_p7)
}
 0x238   : > { %836 = dma.vmem_to_hbm [thread:$0]  (%p1318_p8), %s575_s0, 256, %s577_s2, %s1474_s7, %s1212_s15, %s1212_s15, %s1213_s17  }
 0x239   : > { %s1110_s1 = sshra.s32 %s596_s23, 4  ;;  %s1116_s27 = scalar_lea.hbm %s1593_s13, 64  ;;  %s1111_s1 = int_to_ptr.hbm [resolvable:$true] %s1110_s1 }
 0x23a   : > { %s1112_s20 = scalar_lea.hbm %s1111_s1, 16  ;;  %p1117_p13 = scmp.lt.s32.totalorder %s1111_s1, %s1593_s13 }
 0x23b   : > { %p1113_p10 = scmp.ne.s32.totalorder %s1111_s1, %s1112_s20  ;;  %p1118_p0 = scmp.lt.s32.totalorder %s1116_s27, %s1112_s20 }
 0x23d   : > { %p1114_p11 = pnand %p1113_p10, %p1318_p8  ;;  %p1119_p1 = por %p1118_p0, %p1117_p13 }
 0x23f   : > { %p1115_p12 = pneg %p1114_p11 }
 0x241   : > { %p1120_p2 = pnand %p1119_p1, %p1115_p12 }
 0x243   : > { %1123 = shalt.err (!%p1120_p2)
}
 0x244   : > { %837 = dma.vmem_to_hbm [thread:$0]  (%p1318_p8), %s1470_s4, 256, %s596_s23, %s1474_s7, %s1212_s15, %s1212_s15, %s1213_s17  }
 0x245 PF: > { %s1594_s0 = sld [smem:[#allocation18_spill]] }
 0x246   : > { %s1595_s2 = sld [smem:[#allocation16_spill]] }
 0x24b   : > { %p867_p4 = scmp.ge.s32.totalorder %s1594_s0, 2 }
 0x24c   : > { %s610_s24 = sand.u32 1, %s1595_s2  }
 0x24d   : > { %p853_p5 = pnand %p867_p4, %p1322_p9  ;;  %s611_s19 = scalar_lea.sflag [#allocation4], %s610_s24 }
 0x24f   : > { %p854_p6 = pneg %p853_p5 }
 0x251   : > { %1165 = dma.done.wait (%p854_p6), %s611_s19, 256  }
 0x252   : > { %1167 = vsyncadd (%p854_p6), %s611_s19, 4294967040  ;;  %s1597_s12 = sadd.s32 4294967294, %s1594_s0  }
 0x253   : > { %s620_s28 = sand.u32 1, %s1597_s12  }
 0x254   : > { %s621_s22 = scalar_lea.sflag [#allocation10], %s620_s28 }
 0x255   : > { %1169 = dma.done.wait (%p854_p6), %s621_s22, 512  }
 0x256   : > { %1171 = vsyncadd (%p854_p6), %s621_s22, 4294966784  ;;  %s28_s8 = sadd.s32 1, %s1594_s0   ;;  %s1598_s27 = sld [smem:[#allocation17_spill]] }
 0x257   : > { %p25_p8 = scmp.ge.s32.totalorder %s28_s8, 6   ;;  %s1599_s29 = sld [smem:[#allocation21_spill]] }
 0x258   : > { %s1600_s4 = sld [smem:[#allocation22_spill]]  ;;  %s1601_s24 = smov %s1178_s25 }
 0x259   : > { %s1602_s25 = smov %s1182_s26  ;;  %s1603_s26 = smov %s1369_s14 }
 0x25a   : > { %s1604_s28 = smov %s1198_s30  ;;  %27 = sbr.rel (!%p25_p8) target bundleno = 19 (0x13), region = 125 }
 0x25e   : > { %s1605_s30 = smov %s1600_s4 }
 0x25f   :  { %637 = vsyncpa [#allocation3], 1 }
 0x260   :  { %639 = vsyncpa [#allocation3 + $0x1], 1 }
 0x261   :  { %640 = vsyncpa [#allocation6], 1 }
 0x262   :  { %641 = vsyncpa [#allocation4], 1 }
 0x263   :  { %643 = vsyncpa [#allocation4 + $0x1], 1 }
 0x264   :  { %644 = vsyncpa [#allocation10], 1 }
 0x265   :  { %646 = vsyncpa [#allocation10 + $0x1], 1 }

</bundles_post_ra>
